<compile_context>
chip_gen: v5e
topology: v5e:2x2
jax: 0.10.0
libtpu: 0.0.40
codegen_flags: <defaults>
</compile_context>

<pallas_src>
import jax
import jax.numpy as jnp
from jax.experimental import pallas as pl
from jax.experimental.pallas import tpu as pltpu

_VMEM_LIMIT = 32 * 1024 * 1024
_LANES = 128


# ----------------------------- Pallas kernels ------------------------------

def _conv_bn_relu_pool_kernel(p_ref, w_ref, shift_ref, o_ref):
    # p_ref: (4, bm, K) bf16 -- patches of the 4 conv output positions that
    #        feed each 2x2 pooling window (one row per pooled pixel).
    # w_ref: (K, 128) bf16 -- conv weights with BN scale folded in, output
    #        channels zero-padded to 128 lanes.
    # shift_ref: (1, 128) f32 -- folded BN/conv-bias shift (zero in pad lanes).
    a0 = jnp.dot(p_ref[0], w_ref[...], preferred_element_type=jnp.float32)
    a1 = jnp.dot(p_ref[1], w_ref[...], preferred_element_type=jnp.float32)
    a2 = jnp.dot(p_ref[2], w_ref[...], preferred_element_type=jnp.float32)
    a3 = jnp.dot(p_ref[3], w_ref[...], preferred_element_type=jnp.float32)
    # Scale is folded into w, so the max over the pool window commutes with
    # the per-channel shift and the monotone ReLU: relu(max_i(a_i)+shift)
    # == maxpool(relu(scale*conv+shift)).
    m = jnp.maximum(jnp.maximum(a0, a1), jnp.maximum(a2, a3))
    o_ref[...] = jnp.maximum(m + shift_ref[...], 0.0).astype(o_ref.dtype)


def _linear_kernel(x_ref, w_ref, b_ref, o_ref):
    acc = jnp.dot(x_ref[...], w_ref[...], preferred_element_type=jnp.float32)
    o_ref[...] = (acc + b_ref[...]).astype(o_ref.dtype)


# ------------------------------ Pallas wrappers ----------------------------

def _pick_block_m(m, max_bm=1024):
    """Largest multiple-of-8 row tile dividing m (capped); else full extent."""
    cap = min(max_bm, m)
    if m >= 16:
        cap = min(cap, m // 2)          # keep >=2 grid steps for megacore
    start = (cap // 8) * 8
    for bm in range(start, 7, -8):
        if m % bm == 0:
            return bm
    return m                             # full-extent block is always legal


def conv_bn_relu_pool(patches4, wmat, shift, out_dtype=jnp.bfloat16):
    """patches4: (4, M, K) bf16; wmat: (K, 128) bf16; shift: (1, 128) f32."""
    _, m, k = patches4.shape
    bm = _pick_block_m(m, 1024)
    cost = pl.CostEstimate(
        flops=2 * 4 * m * k * _LANES,
        transcendentals=0,
        bytes_accessed=4 * m * k * 2 + k * _LANES * 2 + _LANES * 4 + m * _LANES * 2,
    )
    return pl.pallas_call(
        _conv_bn_relu_pool_kernel,
        out_shape=jax.ShapeDtypeStruct((m, _LANES), out_dtype),
        grid=(m // bm,),
        in_specs=[
            pl.BlockSpec((4, bm, k), lambda i: (0, i, 0)),
            pl.BlockSpec((k, _LANES), lambda i: (0, 0)),
            pl.BlockSpec((1, _LANES), lambda i: (0, 0)),
        ],
        out_specs=pl.BlockSpec((bm, _LANES), lambda i: (i, 0)),
        compiler_params=pltpu.CompilerParams(
            dimension_semantics=("parallel",),
            vmem_limit_bytes=_VMEM_LIMIT,
        ),
        cost_estimate=cost,
    )(patches4, wmat, shift)


def linear(x, wmat, bias):
    """x: (M, K) bf16; wmat: (K, 128) bf16 (lane-padded); bias: (1, 128) f32."""
    m, k = x.shape
    nout = wmat.shape[1]
    bm = _pick_block_m(m, 512)
    cost = pl.CostEstimate(
        flops=2 * m * k * nout,
        transcendentals=0,
        bytes_accessed=m * k * 2 + k * nout * 2 + nout * 4 + m * nout * 4,
    )
    return pl.pallas_call(
        _linear_kernel,
        out_shape=jax.ShapeDtypeStruct((m, nout), jnp.float32),
        grid=(m // bm,),
        in_specs=[
            pl.BlockSpec((bm, k), lambda i: (i, 0)),
            pl.BlockSpec((k, nout), lambda i: (0, 0)),
            pl.BlockSpec((1, nout), lambda i: (0, 0)),
        ],
        out_specs=pl.BlockSpec((bm, nout), lambda i: (i, 0)),
        compiler_params=pltpu.CompilerParams(
            dimension_semantics=("parallel",),
            vmem_limit_bytes=_VMEM_LIMIT,
        ),
        cost_estimate=cost,
    )(x, wmat, bias)


# ------------------------------- JAX glue -----------------------------------

def _pooled_patches(x_nhwc, k=5, pad=2):
    """im2col grouped by 2x2-pool position.

    Returns (4, N*(H/2)*(W/2), k*k*C); patch element order (dy, dx, ci) matches
    the weight matrix layout [(dy*k + dx)*Cin + ci, co].
    """
    n, h, w, c = x_nhwc.shape
    hh, wh = h // 2, w // 2
    xp = jnp.pad(x_nhwc, ((0, 0), (pad, pad), (pad, pad), (0, 0)))
    groups = []
    for qy in range(2):
        for qx in range(2):
            cols = []
            for dy in range(k):
                for dx in range(k):
                    y0, x0 = qy + dy, qx + dx
                    cols.append(xp[:, y0:y0 + 2 * hh:2, x0:x0 + 2 * wh:2, :])
            g = jnp.stack(cols, axis=3)               # (n, hh, wh, k*k, c)
            groups.append(g.reshape(n * hh * wh, k * k * c))
    return jnp.stack(groups, axis=0)                  # (4, M_pool, K)


def _fold_bn(conv_bias, gamma, beta, mean, var, eps=1e-5):
    # Inference-mode BatchNorm folded to per-channel scale/shift around the
    # conv matmul: y = scale * (P @ W) + shift.
    scale = gamma / jnp.sqrt(var + eps)
    shift = scale * (conv_bias - mean) + beta
    return scale, shift


def _pad_lanes(a, n=_LANES):
    return jnp.pad(a, ((0, 0), (0, n - a.shape[-1])))


def _conv_weight_matrix(w_oihw, scale):
    # (Cout, Cin, kh, kw) -> (kh*kw*Cin, Cout), BN scale folded, lane-padded.
    kh, kw, cin = w_oihw.shape[2], w_oihw.shape[3], w_oihw.shape[1]
    wm = jnp.transpose(w_oihw, (2, 3, 1, 0)).reshape(kh * kw * cin, -1)
    wm = wm * scale[None, :]
    return _pad_lanes(wm).astype(jnp.bfloat16)


def init_params(key):
    ks = jax.random.split(key, 16)
    f32 = jnp.float32
    p = {}
    # conv1: (Cout=16, Cin=1, 5, 5)
    p["w1"] = 0.1 * jax.random.normal(ks[0], (16, 1, 5, 5), f32)
    p["b1"] = 0.1 * jax.random.normal(ks[1], (16,), f32)
    p["g1"] = 1.0 + 0.1 * jax.random.normal(ks[2], (16,), f32)
    p["be1"] = 0.1 * jax.random.normal(ks[3], (16,), f32)
    p["m1"] = 0.1 * jax.random.normal(ks[4], (16,), f32)
    p["v1"] = 0.5 + jnp.abs(jax.random.normal(ks[5], (16,), f32))
    # conv2: (Cout=32, Cin=16, 5, 5)
    p["w2"] = 0.05 * jax.random.normal(ks[6], (32, 16, 5, 5), f32)
    p["b2"] = 0.1 * jax.random.normal(ks[7], (32,), f32)
    p["g2"] = 1.0 + 0.1 * jax.random.normal(ks[8], (32,), f32)
    p["be2"] = 0.1 * jax.random.normal(ks[9], (32,), f32)
    p["m2"] = 0.1 * jax.random.normal(ks[10], (32,), f32)
    p["v2"] = 0.5 + jnp.abs(jax.random.normal(ks[11], (32,), f32))
    # fc: (10, 7*7*32), torch convention (out_features, in_features)
    p["wf"] = 0.02 * jax.random.normal(ks[12], (10, 7 * 7 * 32), f32)
    p["bf"] = 0.1 * jax.random.normal(ks[13], (10,), f32)
    return p


def convnet_forward(x_nchw, p):
    n = x_nchw.shape[0]
    x = jnp.transpose(x_nchw, (0, 2, 3, 1)).astype(jnp.bfloat16)     # NHWC

    # ----- layer 1: conv(1->16,k5,p2) + BN + ReLU + maxpool(2,2), fused -----
    s1, sh1 = _fold_bn(p["b1"], p["g1"], p["be1"], p["m1"], p["v1"])
    wm1 = _conv_weight_matrix(p["w1"], s1)                           # (25, 128)
    sh1p = _pad_lanes(sh1[None, :]).astype(jnp.float32)              # (1, 128)
    p1 = _pooled_patches(x, 5, 2)                                    # (4, N*196, 25)
    y1 = conv_bn_relu_pool(p1, wm1, sh1p)                            # (N*196, 128)
    y1 = y1[:, :16].reshape(n, 14, 14, 16)                           # drop pad lanes

    # ----- layer 2: conv(16->32,k5,p2) + BN + ReLU + maxpool(2,2), fused ----
    s2, sh2 = _fold_bn(p["b2"], p["g2"], p["be2"], p["m2"], p["v2"])
    wm2 = _conv_weight_matrix(p["w2"], s2)                           # (400, 128)
    sh2p = _pad_lanes(sh2[None, :]).astype(jnp.float32)              # (1, 128)
    p2 = _pooled_patches(y1, 5, 2)                                   # (4, N*49, 400)
    y2 = conv_bn_relu_pool(p2, wm2, sh2p)                            # (N*49, 128)
    y2 = y2[:, :32].reshape(n, 7, 7, 32)                             # drop pad lanes

    # ----- fc: flatten in torch's NCHW order, then Linear(1568 -> 10) -------
    flat = jnp.transpose(y2, (0, 3, 1, 2)).reshape(n, 7 * 7 * 32)
    flat = flat.astype(jnp.bfloat16)
    wf = _pad_lanes(p["wf"].T).astype(jnp.bfloat16)                  # (1568, 128)
    bf = _pad_lanes(p["bf"][None, :]).astype(jnp.float32)            # (1, 128)
    out = linear(flat, wf, bf)                                       # (N, 128) f32
    return out[:, :10]


if __name__ == "__main__":
    key = jax.random.PRNGKey(0)
    k_in, k_par = jax.random.split(key)
    x = jax.random.normal(k_in, (2, 1, 28, 28), jnp.float32)         # NCHW, like torch
    params = init_params(k_par)

    fwd = jax.jit(convnet_forward)
    out = fwd(x, params)
    out = jax.block_until_ready(out)
    assert out.shape == (2, 10), out.shape
    assert out.dtype == jnp.float32
    print("KERNEL_OK")
</pallas_src>

<mosaic_0001>
module attributes {stable_mosaic.version = 11 : i64} {
  func.func @_conv_bn_relu_pool_kernel(%arg0: i32, %arg1: memref<4x56x25xbf16, #tpu.memory_space<vmem>>, %arg2: memref<25x128xbf16, #tpu.memory_space<vmem>>, %arg3: memref<1x128xf32, #tpu.memory_space<vmem>>, %arg4: memref<56x128xbf16, #tpu.memory_space<vmem>>) attributes {dimension_semantics = [#tpu.dimension_semantics<parallel>], iteration_bounds = array<i64: 7>, scalar_prefetch = 0 : i64, scratch_operands = 0 : i64, tpu.core_type = #tpu.core_type<tc>, window_params = [{transform_indices = @transform_0, window_bounds = array<i64: 4, 56, 25>}, {pipeline_mode = #tpu.pipeline_mode<synchronous>, transform_indices = @transform_1, window_bounds = array<i64: 25, 128>}, {pipeline_mode = #tpu.pipeline_mode<synchronous>, transform_indices = @transform_2, window_bounds = array<i64: 1, 128>}, {transform_indices = @transform_3, window_bounds = array<i64: 56, 128>}]} {
    %c0 = arith.constant 0 : index
    %c0_0 = arith.constant 0 : index
    %c0_1 = arith.constant 0 : index
    %0 = vector.load %arg1[%c0, %c0_0, %c0_1] : memref<4x56x25xbf16, #tpu.memory_space<vmem>>, vector<1x56x25xbf16>
    %1 = vector.shape_cast %0 : vector<1x56x25xbf16> to vector<56x25xbf16>
    %c0_2 = arith.constant 0 : index
    %c0_3 = arith.constant 0 : index
    %2 = vector.load %arg2[%c0_2, %c0_3] : memref<25x128xbf16, #tpu.memory_space<vmem>>, vector<25x128xbf16>
    %cst = arith.constant dense<0.000000e+00> : vector<56x128xf32>
    %3 = tpu.matmul %1, %2, %cst {dimension_numbers = #tpu.dot_dimension_numbers<[1], [0], [0], [1], [0, 0, 1, 1], [], []>} : vector<56x25xbf16>, vector<25x128xbf16>, vector<56x128xf32> -> vector<56x128xf32>
    %c1 = arith.constant 1 : index
    %c0_4 = arith.constant 0 : index
    %c0_5 = arith.constant 0 : index
    %4 = vector.load %arg1[%c1, %c0_4, %c0_5] : memref<4x56x25xbf16, #tpu.memory_space<vmem>>, vector<1x56x25xbf16>
    %5 = vector.shape_cast %4 : vector<1x56x25xbf16> to vector<56x25xbf16>
    %c0_6 = arith.constant 0 : index
    %c0_7 = arith.constant 0 : index
    %6 = vector.load %arg2[%c0_6, %c0_7] : memref<25x128xbf16, #tpu.memory_space<vmem>>, vector<25x128xbf16>
    %cst_8 = arith.constant dense<0.000000e+00> : vector<56x128xf32>
    %7 = tpu.matmul %5, %6, %cst_8 {dimension_numbers = #tpu.dot_dimension_numbers<[1], [0], [0], [1], [0, 0, 1, 1], [], []>} : vector<56x25xbf16>, vector<25x128xbf16>, vector<56x128xf32> -> vector<56x128xf32>
    %c2 = arith.constant 2 : index
    %c0_9 = arith.constant 0 : index
    %c0_10 = arith.constant 0 : index
    %8 = vector.load %arg1[%c2, %c0_9, %c0_10] : memref<4x56x25xbf16, #tpu.memory_space<vmem>>, vector<1x56x25xbf16>
    %9 = vector.shape_cast %8 : vector<1x56x25xbf16> to vector<56x25xbf16>
    %c0_11 = arith.constant 0 : index
    %c0_12 = arith.constant 0 : index
    %10 = vector.load %arg2[%c0_11, %c0_12] : memref<25x128xbf16, #tpu.memory_space<vmem>>, vector<25x128xbf16>
    %cst_13 = arith.constant dense<0.000000e+00> : vector<56x128xf32>
    %11 = tpu.matmul %9, %10, %cst_13 {dimension_numbers = #tpu.dot_dimension_numbers<[1], [0], [0], [1], [0, 0, 1, 1], [], []>} : vector<56x25xbf16>, vector<25x128xbf16>, vector<56x128xf32> -> vector<56x128xf32>
    %c3 = arith.constant 3 : index
    %c0_14 = arith.constant 0 : index
    %c0_15 = arith.constant 0 : index
    %12 = vector.load %arg1[%c3, %c0_14, %c0_15] : memref<4x56x25xbf16, #tpu.memory_space<vmem>>, vector<1x56x25xbf16>
    %13 = vector.shape_cast %12 : vector<1x56x25xbf16> to vector<56x25xbf16>
    %c0_16 = arith.constant 0 : index
    %c0_17 = arith.constant 0 : index
    %14 = vector.load %arg2[%c0_16, %c0_17] : memref<25x128xbf16, #tpu.memory_space<vmem>>, vector<25x128xbf16>
    %cst_18 = arith.constant dense<0.000000e+00> : vector<56x128xf32>
    %15 = tpu.matmul %13, %14, %cst_18 {dimension_numbers = #tpu.dot_dimension_numbers<[1], [0], [0], [1], [0, 0, 1, 1], [], []>} : vector<56x25xbf16>, vector<25x128xbf16>, vector<56x128xf32> -> vector<56x128xf32>
    %16 = arith.maximumf %3, %7 : vector<56x128xf32>
    %17 = arith.maximumf %11, %15 : vector<56x128xf32>
    %18 = arith.maximumf %16, %17 : vector<56x128xf32>
    %c0_19 = arith.constant 0 : index
    %c0_20 = arith.constant 0 : index
    %19 = vector.load %arg3[%c0_19, %c0_20] : memref<1x128xf32, #tpu.memory_space<vmem>>, vector<1x128xf32>
    %20 = vector.broadcast %19 : vector<1x128xf32> to vector<56x128xf32>
    %21 = arith.addf %18, %20 : vector<56x128xf32>
    %cst_21 = arith.constant 0.000000e+00 : f32
    %22 = vector.broadcast %cst_21 : f32 to vector<56x128xf32>
    %23 = arith.maximumf %21, %22 : vector<56x128xf32>
    %24 = arith.truncf %23 : vector<56x128xf32> to vector<56x128xbf16>
    %c0_22 = arith.constant 0 : index
    %c0_23 = arith.constant 0 : index
    %25 = vector.load %arg4[%c0_22, %c0_23] : memref<56x128xbf16, #tpu.memory_space<vmem>>, vector<56x128xbf16>
    tpu.vector_store %arg4[%c0_22, %c0_23], %24 {strides = array<i32>} : memref<56x128xbf16, #tpu.memory_space<vmem>>, vector<56x128xbf16>,
    return
  }
  func.func @transform_0(%arg0: i32) -> (i32, i32, i32) {
    %c0_i32 = arith.constant 0 : i32
    %c0_i32_0 = arith.constant 0 : i32
    %c0_i32_1 = arith.constant 0 : i32
    return %c0_i32, %arg0, %c0_i32_0 : i32, i32, i32
  }
  func.func @transform_1(%arg0: i32) -> (i32, i32) {
    %c0_i32 = arith.constant 0 : i32
    %c0_i32_0 = arith.constant 0 : i32
    %c0_i32_1 = arith.constant 0 : i32
    return %c0_i32, %c0_i32_0 : i32, i32
  }
  func.func @transform_2(%arg0: i32) -> (i32, i32) {
    %c0_i32 = arith.constant 0 : i32
    %c0_i32_0 = arith.constant 0 : i32
    %c0_i32_1 = arith.constant 0 : i32
    return %c0_i32, %c0_i32_0 : i32, i32
  }
  func.func @transform_3(%arg0: i32) -> (i32, i32) {
    %c0_i32 = arith.constant 0 : i32
    %c0_i32_0 = arith.constant 0 : i32
    return %arg0, %c0_i32 : i32, i32
  }
}

module attributes {stable_mosaic.version = 11 : i64} {
  func.func @_conv_bn_relu_pool_kernel(%arg0: i32, %arg1: memref<4x98x400xbf16, #tpu.memory_space<vmem>>, %arg2: memref<400x128xbf16, #tpu.memory_space<vmem>>, %arg3: memref<1x128xf32, #tpu.memory_space<vmem>>, %arg4: memref<98x128xbf16, #tpu.memory_space<vmem>>) attributes {dimension_semantics = [#tpu.dimension_semantics<parallel>], iteration_bounds = array<i64: 1>, scalar_prefetch = 0 : i64, scratch_operands = 0 : i64, tpu.core_type = #tpu.core_type<tc>, window_params = [{transform_indices = @transform_0, window_bounds = array<i64: 4, 98, 400>}, {pipeline_mode = #tpu.pipeline_mode<synchronous>, transform_indices = @transform_1, window_bounds = array<i64: 400, 128>}, {pipeline_mode = #tpu.pipeline_mode<synchronous>, transform_indices = @transform_2, window_bounds = array<i64: 1, 128>}, {transform_indices = @transform_3, window_bounds = array<i64: 98, 128>}]} {
    %c0 = arith.constant 0 : index
    %c0_0 = arith.constant 0 : index
    %c0_1 = arith.constant 0 : index
    %0 = vector.load %arg1[%c0, %c0_0, %c0_1] : memref<4x98x400xbf16, #tpu.memory_space<vmem>>, vector<1x98x400xbf16>
    %1 = vector.shape_cast %0 : vector<1x98x400xbf16> to vector<98x400xbf16>
    %c0_2 = arith.constant 0 : index
    %c0_3 = arith.constant 0 : index
    %2 = vector.load %arg2[%c0_2, %c0_3] : memref<400x128xbf16, #tpu.memory_space<vmem>>, vector<400x128xbf16>
    %cst = arith.constant dense<0.000000e+00> : vector<98x128xf32>
    %3 = tpu.matmul %1, %2, %cst {dimension_numbers = #tpu.dot_dimension_numbers<[1], [0], [0], [1], [0, 0, 1, 1], [], []>} : vector<98x400xbf16>, vector<400x128xbf16>, vector<98x128xf32> -> vector<98x128xf32>
    %c1 = arith.constant 1 : index
    %c0_4 = arith.constant 0 : index
    %c0_5 = arith.constant 0 : index
    %4 = vector.load %arg1[%c1, %c0_4, %c0_5] : memref<4x98x400xbf16, #tpu.memory_space<vmem>>, vector<1x98x400xbf16>
    %5 = vector.shape_cast %4 : vector<1x98x400xbf16> to vector<98x400xbf16>
    %c0_6 = arith.constant 0 : index
    %c0_7 = arith.constant 0 : index
    %6 = vector.load %arg2[%c0_6, %c0_7] : memref<400x128xbf16, #tpu.memory_space<vmem>>, vector<400x128xbf16>
    %cst_8 = arith.constant dense<0.000000e+00> : vector<98x128xf32>
    %7 = tpu.matmul %5, %6, %cst_8 {dimension_numbers = #tpu.dot_dimension_numbers<[1], [0], [0], [1], [0, 0, 1, 1], [], []>} : vector<98x400xbf16>, vector<400x128xbf16>, vector<98x128xf32> -> vector<98x128xf32>
    %c2 = arith.constant 2 : index
    %c0_9 = arith.constant 0 : index
    %c0_10 = arith.constant 0 : index
    %8 = vector.load %arg1[%c2, %c0_9, %c0_10] : memref<4x98x400xbf16, #tpu.memory_space<vmem>>, vector<1x98x400xbf16>
    %9 = vector.shape_cast %8 : vector<1x98x400xbf16> to vector<98x400xbf16>
    %c0_11 = arith.constant 0 : index
    %c0_12 = arith.constant 0 : index
    %10 = vector.load %arg2[%c0_11, %c0_12] : memref<400x128xbf16, #tpu.memory_space<vmem>>, vector<400x128xbf16>
    %cst_13 = arith.constant dense<0.000000e+00> : vector<98x128xf32>
    %11 = tpu.matmul %9, %10, %cst_13 {dimension_numbers = #tpu.dot_dimension_numbers<[1], [0], [0], [1], [0, 0, 1, 1], [], []>} : vector<98x400xbf16>, vector<400x128xbf16>, vector<98x128xf32> -> vector<98x128xf32>
    %c3 = arith.constant 3 : index
    %c0_14 = arith.constant 0 : index
    %c0_15 = arith.constant 0 : index
    %12 = vector.load %arg1[%c3, %c0_14, %c0_15] : memref<4x98x400xbf16, #tpu.memory_space<vmem>>, vector<1x98x400xbf16>
    %13 = vector.shape_cast %12 : vector<1x98x400xbf16> to vector<98x400xbf16>
    %c0_16 = arith.constant 0 : index
    %c0_17 = arith.constant 0 : index
    %14 = vector.load %arg2[%c0_16, %c0_17] : memref<400x128xbf16, #tpu.memory_space<vmem>>, vector<400x128xbf16>
    %cst_18 = arith.constant dense<0.000000e+00> : vector<98x128xf32>
    %15 = tpu.matmul %13, %14, %cst_18 {dimension_numbers = #tpu.dot_dimension_numbers<[1], [0], [0], [1], [0, 0, 1, 1], [], []>} : vector<98x400xbf16>, vector<400x128xbf16>, vector<98x128xf32> -> vector<98x128xf32>
    %16 = arith.maximumf %3, %7 : vector<98x128xf32>
    %17 = arith.maximumf %11, %15 : vector<98x128xf32>
    %18 = arith.maximumf %16, %17 : vector<98x128xf32>
    %c0_19 = arith.constant 0 : index
    %c0_20 = arith.constant 0 : index
    %19 = vector.load %arg3[%c0_19, %c0_20] : memref<1x128xf32, #tpu.memory_space<vmem>>, vector<1x128xf32>
    %20 = vector.broadcast %19 : vector<1x128xf32> to vector<98x128xf32>
    %21 = arith.addf %18, %20 : vector<98x128xf32>
    %cst_21 = arith.constant 0.000000e+00 : f32
    %22 = vector.broadcast %cst_21 : f32 to vector<98x128xf32>
    %23 = arith.maximumf %21, %22 : vector<98x128xf32>
    %24 = arith.truncf %23 : vector<98x128xf32> to vector<98x128xbf16>
    %c0_22 = arith.constant 0 : index
    %c0_23 = arith.constant 0 : index
    %25 = vector.load %arg4[%c0_22, %c0_23] : memref<98x128xbf16, #tpu.memory_space<vmem>>, vector<98x128xbf16>
    tpu.vector_store %arg4[%c0_22, %c0_23], %24 {strides = array<i32>} : memref<98x128xbf16, #tpu.memory_space<vmem>>, vector<98x128xbf16>,
    return
  }
  func.func @transform_0(%arg0: i32) -> (i32, i32, i32) {
    %c0_i32 = arith.constant 0 : i32
    %c0_i32_0 = arith.constant 0 : i32
    %c0_i32_1 = arith.constant 0 : i32
    return %c0_i32, %arg0, %c0_i32_0 : i32, i32, i32
  }
  func.func @transform_1(%arg0: i32) -> (i32, i32) {
    %c0_i32 = arith.constant 0 : i32
    %c0_i32_0 = arith.constant 0 : i32
    %c0_i32_1 = arith.constant 0 : i32
    return %c0_i32, %c0_i32_0 : i32, i32
  }
  func.func @transform_2(%arg0: i32) -> (i32, i32) {
    %c0_i32 = arith.constant 0 : i32
    %c0_i32_0 = arith.constant 0 : i32
    %c0_i32_1 = arith.constant 0 : i32
    return %c0_i32, %c0_i32_0 : i32, i32
  }
  func.func @transform_3(%arg0: i32) -> (i32, i32) {
    %c0_i32 = arith.constant 0 : i32
    %c0_i32_0 = arith.constant 0 : i32
    return %arg0, %c0_i32 : i32, i32
  }
}

module attributes {stable_mosaic.version = 11 : i64} {
  func.func @_linear_kernel(%arg0: i32, %arg1: memref<2x1568xbf16, #tpu.memory_space<vmem>>, %arg2: memref<1568x128xbf16, #tpu.memory_space<vmem>>, %arg3: memref<1x128xf32, #tpu.memory_space<vmem>>, %arg4: memref<2x128xf32, #tpu.memory_space<vmem>>) attributes {dimension_semantics = [#tpu.dimension_semantics<parallel>], iteration_bounds = array<i64: 1>, scalar_prefetch = 0 : i64, scratch_operands = 0 : i64, tpu.core_type = #tpu.core_type<tc>, window_params = [{transform_indices = @transform_0, window_bounds = array<i64: 2, 1568>}, {pipeline_mode = #tpu.pipeline_mode<synchronous>, transform_indices = @transform_1, window_bounds = array<i64: 1568, 128>}, {pipeline_mode = #tpu.pipeline_mode<synchronous>, transform_indices = @transform_2, window_bounds = array<i64: 1, 128>}, {transform_indices = @transform_3, window_bounds = array<i64: 2, 128>}]} {
    %c0 = arith.constant 0 : index
    %c0_0 = arith.constant 0 : index
    %0 = vector.load %arg1[%c0, %c0_0] : memref<2x1568xbf16, #tpu.memory_space<vmem>>, vector<2x1568xbf16>
    %c0_1 = arith.constant 0 : index
    %c0_2 = arith.constant 0 : index
    %1 = vector.load %arg2[%c0_1, %c0_2] : memref<1568x128xbf16, #tpu.memory_space<vmem>>, vector<1568x128xbf16>
    %cst = arith.constant dense<0.000000e+00> : vector<2x128xf32>
    %2 = tpu.matmul %0, %1, %cst {dimension_numbers = #tpu.dot_dimension_numbers<[1], [0], [0], [1], [0, 0, 1, 1], [], []>} : vector<2x1568xbf16>, vector<1568x128xbf16>, vector<2x128xf32> -> vector<2x128xf32>
    %c0_3 = arith.constant 0 : index
    %c0_4 = arith.constant 0 : index
    %3 = vector.load %arg3[%c0_3, %c0_4] : memref<1x128xf32, #tpu.memory_space<vmem>>, vector<1x128xf32>
    %4 = vector.broadcast %3 : vector<1x128xf32> to vector<2x128xf32>
    %5 = arith.addf %2, %4 : vector<2x128xf32>
    %c0_5 = arith.constant 0 : index
    %c0_6 = arith.constant 0 : index
    %6 = vector.load %arg4[%c0_5, %c0_6] : memref<2x128xf32, #tpu.memory_space<vmem>>, vector<2x128xf32>
    tpu.vector_store %arg4[%c0_5, %c0_6], %5 {strides = array<i32>} : memref<2x128xf32, #tpu.memory_space<vmem>>, vector<2x128xf32>,
    return
  }
  func.func @transform_0(%arg0: i32) -> (i32, i32) {
    %c0_i32 = arith.constant 0 : i32
    %c0_i32_0 = arith.constant 0 : i32
    return %arg0, %c0_i32 : i32, i32
  }
  func.func @transform_1(%arg0: i32) -> (i32, i32) {
    %c0_i32 = arith.constant 0 : i32
    %c0_i32_0 = arith.constant 0 : i32
    %c0_i32_1 = arith.constant 0 : i32
    return %c0_i32, %c0_i32_0 : i32, i32
  }
  func.func @transform_2(%arg0: i32) -> (i32, i32) {
    %c0_i32 = arith.constant 0 : i32
    %c0_i32_0 = arith.constant 0 : i32
    %c0_i32_1 = arith.constant 0 : i32
    return %c0_i32, %c0_i32_0 : i32, i32
  }
  func.func @transform_3(%arg0: i32) -> (i32, i32) {
    %c0_i32 = arith.constant 0 : i32
    %c0_i32_0 = arith.constant 0 : i32
    return %arg0, %c0_i32 : i32, i32
  }
}

</mosaic_0001>

<bundles_post_ra>
// kernel: convnet_forward.3
= control target key start
LH: loop header
LB: loop body
LE: loop exit
PB: predicated region body
PF: predicated region fallthrough
CT: control target
= control target key end

     0   :  { %s934_s12 = smov 0   ;;  %s936_s13 = smov 0   ;;  %s1065_s0 = inlined_call_operand.vmem [shape: bf16[4,392,25], index: 0, kind: input, shape index: {}]   ;;  %s1066_s1 = inlined_call_operand.vmem [shape: bf16[25,128], index: 1, kind: input, shape index: {}]   ;;  %s1067_s2 = inlined_call_operand.vmem [shape: f32[1,128], index: 2, kind: input, shape index: {}]   ;;  %s1068_s3 = inlined_call_operand.vmem [shape: bf16[392,128], index: 3, kind: output, shape index: {}]  }
   0x1   :  { %s938_s14 = smov 0  }
   0x2 LB: > { %s727_s15 = sadd.s32 4294967295, %s911_s14   ;;  %s951_s16 = sadd.s32 1, %s911_s14   ;;  %s911_s14 = sphi %s938_s14, %s1071_s14   ;;  %s907_s13 = sphi %s936_s13, %s1070_s13   ;;  %s903_s12 = sphi %s934_s12, %s1069_s12  }
   0x3   : > { %s17_s17 = ssub.s32 %s911_s14, %s951_s16  ;;  %s20_s18 = sadd.s32 1, %s907_s13 }
   0x4   : > { %p18_p0 = scmp.eq.s32.totalorder %s17_s17, 0  ;;  %p27_p1 = scmp.ne.s32.totalorder %s907_s13, %s903_s12 }
   0x5   : > { %p28_p2 = scmp.eq.s32.totalorder %s911_s14, 0  ;;  %p730_p4 = scmp.ge.s32.totalorder %s911_s14, 7 }
   0x6   : > { %s960_s19 = scalar_select %p18_p0, %s907_s13, %s20_s18  }
   0x7   : > { %p29_p3 = por %p28_p2, %p27_p1  ;;  %127 = sbr.rel (%p730_p4) target bundleno = 33 (0x21), region = 24 }
   0xc   : > { %130 = sbr.rel (!%p29_p3) target bundleno = 33 (0x21), region = 28  ;;  %s132_s20 = sand.u32 (%p29_p3), 1, %s907_s13  }
   0xd   : > { %s829_s21 = smul.u32 (%p29_p3), 28, %s911_s14 }
   0xe   : > { %s861_s22 = smul.u32 (%p29_p3), 112, %s132_s20 }
   0xf   : > { %s968_s25 = scalar_lea.vmem (%p29_p3), %s1065_s0, %s829_s21 }
  0x10   : > { %v154_v0 = vld [vmem:[%s968_s25] sm:$0xff] (%p29_p3)   ;;  %v158_v1 = vld [vmem:[%s968_s25 + $0x8] sm:$0xff] (%p29_p3)   ;;  %v162_v2 = vld [vmem:[%s968_s25 + $0x10] sm:$0xff] (%p29_p3)   ;;  %s134_s26 = scalar_lea.vmem (%p29_p3), [#allocation2], %s861_s22 }
  0x11   : > { %155 = vst [vmem:[%s134_s26] sm:$0xff] %v154_v0   ;;  %v166_v3 = vld [vmem:[%s968_s25 + $0x18] sm:$0xf]  ;;  %v168_v4 = vld [vmem:[%s968_s25 + $0xc4] sm:$0xff]   ;;  %v172_v5 = vld [vmem:[%s968_s25 + $0xcc] sm:$0xff]  }
  0x12   : > { %159 = vst [vmem:[%s134_s26 + $0x8] sm:$0xff] %v158_v1   ;;  %v176_v6 = vld [vmem:[%s968_s25 + $0xd4] sm:$0xff]   ;;  %v180_v7 = vld [vmem:[%s968_s25 + $0xdc] sm:$0xf]  ;;  %v182_v8 = vld [vmem:[%s968_s25 + $0x188] sm:$0xff]  }
  0x13   : > { %163 = vst [vmem:[%s134_s26 + $0x10] sm:$0xff] %v162_v2   ;;  %v186_v9 = vld [vmem:[%s968_s25 + $0x190] sm:$0xff]   ;;  %v190_v10 = vld [vmem:[%s968_s25 + $0x198] sm:$0xff]   ;;  %v194_v11 = vld [vmem:[%s968_s25 + $0x1a0] sm:$0xf] }
  0x14   : > { %167 = vst [vmem:[%s134_s26 + $0x18] sm:$0xf] %v166_v3  ;;  %v196_v12 = vld [vmem:[%s968_s25 + $0x24c] sm:$0xff]   ;;  %v200_v13 = vld [vmem:[%s968_s25 + $0x254] sm:$0xff]   ;;  %v204_v14 = vld [vmem:[%s968_s25 + $0x25c] sm:$0xff]  }
  0x15   : > { %169 = vst [vmem:[%s134_s26 + $0x1c] sm:$0xff] %v168_v4   ;;  %v208_v15 = vld [vmem:[%s968_s25 + $0x264] sm:$0xf] }
  0x16   : > { %173 = vst [vmem:[%s134_s26 + $0x24] sm:$0xff] %v172_v5  }
  0x17   : > { %177 = vst [vmem:[%s134_s26 + $0x2c] sm:$0xff] %v176_v6  }
  0x18   : > { %181 = vst [vmem:[%s134_s26 + $0x34] sm:$0xf] %v180_v7 }
  0x19   : > { %183 = vst [vmem:[%s134_s26 + $0x38] sm:$0xff] %v182_v8  }
  0x1a   : > { %187 = vst [vmem:[%s134_s26 + $0x40] sm:$0xff] %v186_v9  }
  0x1b   : > { %191 = vst [vmem:[%s134_s26 + $0x48] sm:$0xff] %v190_v10  }
  0x1c   : > { %195 = vst [vmem:[%s134_s26 + $0x50] sm:$0xf] %v194_v11 }
  0x1d   : > { %197 = vst [vmem:[%s134_s26 + $0x54] sm:$0xff] %v196_v12  }
  0x1e   : > { %201 = vst [vmem:[%s134_s26 + $0x5c] sm:$0xff] %v200_v13  }
  0x1f   : > { %205 = vst [vmem:[%s134_s26 + $0x64] sm:$0xff] %v204_v14  }
  0x20   : > { %209 = vst [vmem:[%s134_s26 + $0x6c] sm:$0xf] %v208_v15 }
  0x21 PF: > { %p732_p5 = scmp.ge.s32.totalorder %s911_s14, 1  ;;  %p288_p6 = scmp.lt.s32.totalorder %s911_s14, 8 }
  0x23   : > { %p289_p7 = pnand %p732_p5, %p288_p6 }
  0x24   : > { %s295_s4 = sand.u32 (!%p289_p7), 1, %s903_s12   ;;  %s319_s9 = smul.u32 (!%p289_p7), 7, %s727_s15 }
  0x25   : > { %292 = sbr.rel (%p289_p7) target bundleno = 247 (0xf7), region = 69 }
  0x26   : > { %s862_s5 = smul.u32 (!%p289_p7), 112, %s295_s4  ;;  %p320_p8 = scmp.lt.s32.totalorder (!%p289_p7), %s319_s9, 48 }
  0x28   : > { %s998_s8 = scalar_lea.vmem (!%p289_p7), [#allocation2], %s862_s5 }
  0x2a   : > { %v752_v16 = vld [vmem:[%s1066_s1 + $0x8] sm:$0xf]  ;;  %v834_v17 = vld [vmem:[%s1066_s1 + $0x8] sm:$0x10]  ;;  %vm379_vm0 = vcmask 1043456   ;;  %vm380_vm1 = vcmask 1044480  }
  0x2b   : > { %v753_v18 = vor.u32 %v834_v17, %v752_v16  ;;  %v913_v19 = vmov 65535   ;;  %v833_v23 = vld [vmem:[%s1066_s1] sm:$0xff]  ;;  %vm366_vm2 = vcmask 203776   ;;  %v838_v26 = vld [vmem:[%s998_s8 + $0x38] sm:$0xff]  ;;  %v831_v28 = vld [vmem:[%s998_s8 + $0x8] sm:$0xff]  ;;  %s1073_s9 = smov (!%p320_p8, %s319_s9), 48 }
  0x2c   : > { %v381_v20 = vsel %vm379_vm0, 4294967295, %v913_v19  ;;  %v830_v24 = vld [vmem:[%s998_s8] sm:$0xff]  ;;  %v841_v27 = vld [vmem:[%s998_s8 + $0x54] sm:$0xff]  ;;  %v837_v33 = vld [vmem:[%s998_s8 + $0x2c] sm:$0xff]  ;;  %s733_s12 = sshll.u32 %s1073_s9, 2 }
  0x2d   : > { %v382_v21 = vsel %vm380_vm1, %v381_v20, 0  ;;  %v835_v25 = vld [vmem:[%s998_s8 + $0x1c] sm:$0xff]  ;;  %v836_v29 = vld [vmem:[%s998_s8 + $0x24] sm:$0xff]  ;;  %v832_v32 = vld [vmem:[%s998_s8 + $0x10] sm:$0xff]  ;;  %s1044_s17 = scalar_lea.vmem %s1068_s3, %s733_s12 }
  0x2e   : > { %v384_v22 = vand.u32 %v753_v18, %v382_v21  ;;  %v839_v30 = vld [vmem:[%s998_s8 + $0x40] sm:$0xff]  ;;  %v840_v34 = vld [vmem:[%s998_s8 + $0x48] sm:$0xff]  ;;  %v332_v36 = vld [vmem:[%s998_s8 + $0x18] sm:$0xf] }
  0x2f   : > { %v842_v31 = vld [vmem:[%s998_s8 + $0x5c] sm:$0xff]  ;;  %v843_v35 = vld [vmem:[%s998_s8 + $0x64] sm:$0xff]  ;;  %v764_v37 = vld [vmem:[%s998_s8 + $0x34] sm:$0xf]  ;;  %v350_v40 = vunpack.c.l.b16 %v332_v36 }
  0x30   : > { %392 = vmatpush.bf16.msra.mxu0 %v384_v22  ;;  %458 = vmatpush.bf16.msra.mxu1 %v384_v22  ;;  %v787_v38 = vld [vmem:[%s998_s8 + $0x50] sm:$0xf]  ;;  %v810_v39 = vld [vmem:[%s998_s8 + $0x6c] sm:$0xf]  ;;  %v435_v41 = vunpack.c.l.b16 %v764_v37 }
  0x31   : > { %524 = vmatpush.bf16.msra.mxu2 %v384_v22  ;;  %590 = vmatpush.bf16.msra.mxu3 %v384_v22  ;;  %v501_v42 = vunpack.c.l.b16 %v787_v38  ;;  %v567_v43 = vunpack.c.l.b16 %v810_v39  ;;  %v354_v44 = vpack.c.b16 %v350_v40, %v350_v40  ;;  %v1037_v57 = vld [vmem:[%s1067_s2] ss:$0 sm:$0xff] }
  0x32   : > { %v439_v45 = vpack.c.b16 %v435_v41, %v435_v41 }
  0x33   : > { %v505_v46 = vpack.c.b16 %v501_v42, %v501_v42  ;;  %v571_v47 = vpack.c.b16 %v567_v43, %v567_v43 }
  0x34   : > { %393 = vmatpush.bf16.msra.mxu0 %v833_v23  ;;  %459 = vmatpush.bf16.msra.mxu1 %v833_v23 }
  0x35   : > { %525 = vmatpush.bf16.msra.mxu2 %v833_v23  ;;  %591 = vmatpush.bf16.msra.mxu3 %v833_v23 }
  0x37   : > { %754 = vmatmul.msk.bf16.vlgmr.msra.gmra.mxu0 %vm366_vm2, %v830_v24  ;;  %777 = vmatmul.msk.bf16.vlgmr.msra.gmra.mxu1 %vm366_vm2, %v835_v25 }
  0x38   : > { %800 = vmatmul.msk.bf16.vlgmr.msra.gmra.mxu2 %vm366_vm2, %v838_v26  ;;  %823 = vmatmul.msk.bf16.vlgmr.msra.gmra.mxu3 %vm366_vm2, %v841_v27 }
  0x47   : > { %755 = vmatmul.msk.bf16.gmra.mxu0 %vm366_vm2, %v831_v28  ;;  %778 = vmatmul.msk.bf16.gmra.mxu1 %vm366_vm2, %v836_v29 }
  0x48   : > { %801 = vmatmul.msk.bf16.gmra.mxu2 %vm366_vm2, %v839_v30  ;;  %824 = vmatmul.msk.bf16.gmra.mxu3 %vm366_vm2, %v842_v31 }
  0x57   : > { %756 = vmatmul.msk.bf16.gmra.mxu0 %vm366_vm2, %v832_v32  ;;  %779 = vmatmul.msk.bf16.gmra.mxu1 %vm366_vm2, %v837_v33 }
  0x58   : > { %802 = vmatmul.msk.bf16.gmra.mxu2 %vm366_vm2, %v840_v34  ;;  %825 = vmatmul.msk.bf16.gmra.mxu3 %vm366_vm2, %v843_v35 }
  0x67   : > { %757 = vmatmul.msk.bf16.gmra.mxu0 %vm366_vm2, %v354_v44  ;;  %780 = vmatmul.msk.bf16.gmra.mxu1 %vm366_vm2, %v439_v45 }
  0x68   : > { %803 = vmatmul.msk.bf16.gmra.mxu2 %vm366_vm2, %v505_v46  ;;  %826 = vmatmul.msk.bf16.gmra.mxu3 %vm366_vm2, %v571_v47 }
  0xb4   : > { %v395_v48 = vpop.f32.mrf.mxu0  ;;  %v461_v49 = vpop.f32.mrf.mxu1 }
  0xb5   : > { %v612_v54 = vmax.f32 %v395_v48, %v461_v49 }
  0xbb   : > { %v527_v50 = vpop.f32.mrf.mxu2  ;;  %v593_v51 = vpop.f32.mrf.mxu3 }
  0xbc   : > { %v397_v52 = vpop.f32.mrf.mxu0  ;;  %v463_v53 = vpop.f32.mrf.mxu1  ;;  %v619_v55 = vmax.f32 %v527_v50, %v593_v51 }
  0xbd   : > { %v613_v60 = vmax.f32 %v397_v52, %v463_v53 }
  0xbe   : > { %v626_v56 = vmax.f32 %v612_v54, %v619_v55 }
  0xc0   : > { %v637_v0 = vadd.f32 %v1037_v57, %v626_v56 }
  0xc2   : > { %v644_v3 = vmax.f32 %v637_v0, 0.0 }
  0xc3   : > { %v529_v58 = vpop.f32.mrf.mxu2  ;;  %v595_v59 = vpop.f32.mrf.mxu3 }
  0xc4   : > { %v620_v61 = vmax.f32 %v529_v58, %v595_v59  ;;  %v400_v62 = vpop.f32.mrf.mxu0  ;;  %v466_v63 = vpop.f32.mrf.mxu1 }
  0xc5   : > { %v614_v10 = vmax.f32 %v400_v62, %v466_v63 }
  0xc6   : > { %v627_v1 = vmax.f32 %v613_v60, %v620_v61 }
  0xc8   : > { %v638_v2 = vadd.f32 %v1037_v57, %v627_v1 }
  0xca   : > { %v645_v4 = vmax.f32 %v638_v2, 0.0 }
  0xcb   : > { %v532_v5 = vpop.f32.mrf.mxu2  ;;  %v598_v6 = vpop.f32.mrf.mxu3 }
  0xcc   : > { %v847_v7 = vpack.c.bf16 %v645_v4, %v644_v3  ;;  %v402_v8 = vpop.f32.mrf.mxu0  ;;  %v468_v9 = vpop.f32.mrf.mxu1  ;;  %v621_v11 = vmax.f32 %v532_v5, %v598_v6 }
  0xcd   : > { %v615_v15 = vmax.f32 %v402_v8, %v468_v9 }
  0xce   : > { %848 = vst [vmem:[%s1044_s17] sm:$0xff] %v847_v7   ;;  %v628_v12 = vmax.f32 %v614_v10, %v621_v11 }
  0xd0   : > { %v639_v19 = vadd.f32 %v1037_v57, %v628_v12 }
  0xd2   : > { %v646_v22 = vmax.f32 %v639_v19, 0.0 }
  0xd3   : > { %v534_v13 = vpop.f32.mrf.mxu2  ;;  %v600_v14 = vpop.f32.mrf.mxu3 }
  0xd4   : > { %v622_v16 = vmax.f32 %v534_v13, %v600_v14  ;;  %v405_v17 = vpop.f32.mrf.mxu0  ;;  %v471_v18 = vpop.f32.mrf.mxu1 }
  0xd5   : > { %v616_v29 = vmax.f32 %v405_v17, %v471_v18 }
  0xd6   : > { %v629_v20 = vmax.f32 %v615_v15, %v622_v16 }
  0xd8   : > { %v640_v21 = vadd.f32 %v1037_v57, %v629_v20 }
  0xda   : > { %v647_v23 = vmax.f32 %v640_v21, 0.0 }
  0xdb   : > { %v537_v24 = vpop.f32.mrf.mxu2  ;;  %v603_v25 = vpop.f32.mrf.mxu3 }
  0xdc   : > { %v852_v26 = vpack.c.bf16 %v647_v23, %v646_v22  ;;  %v407_v27 = vpop.f32.mrf.mxu0  ;;  %v473_v28 = vpop.f32.mrf.mxu1  ;;  %v623_v30 = vmax.f32 %v537_v24, %v603_v25 }
  0xdd   : > { %v617_v34 = vmax.f32 %v407_v27, %v473_v28 }
  0xde   : > { %859 = vst [vmem:[%s1044_s17 + $0x8] sm:$0xff] %v852_v26   ;;  %v630_v31 = vmax.f32 %v616_v29, %v623_v30 }
  0xe0   : > { %v641_v38 = vadd.f32 %v1037_v57, %v630_v31 }
  0xe2   : > { %v648_v41 = vmax.f32 %v641_v38, 0.0 }
  0xe3   : > { %v539_v32 = vpop.f32.mrf.mxu2  ;;  %v605_v33 = vpop.f32.mrf.mxu3 }
  0xe4   : > { %v624_v35 = vmax.f32 %v539_v32, %v605_v33  ;;  %v410_v36 = vpop.f32.mrf.mxu0  ;;  %v476_v37 = vpop.f32.mrf.mxu1 }
  0xe5   : > { %v618_v43 = vmax.f32 %v410_v36, %v476_v37 }
  0xe6   : > { %v631_v39 = vmax.f32 %v617_v34, %v624_v35 }
  0xe8   : > { %v642_v40 = vadd.f32 %v1037_v57, %v631_v39 }
  0xea   : > { %v649_v42 = vmax.f32 %v642_v40, 0.0 }
  0xeb   : > { %v542_v44 = vpop.f32.mrf.mxu2  ;;  %v608_v45 = vpop.f32.mrf.mxu3 }
  0xec   : > { %v857_v46 = vpack.c.bf16 %v649_v42, %v648_v41  ;;  %v625_v47 = vmax.f32 %v542_v44, %v608_v45  ;;  %v412_v48 = vpop.f32.mrf.mxu0  ;;  %v478_v49 = vpop.f32.mrf.mxu1 }
  0xee   : > { %860 = vst [vmem:[%s1044_s17 + $0x10] sm:$0xff] %v857_v46   ;;  %v632_v50 = vmax.f32 %v618_v43, %v625_v47 }
  0xf0   : > { %v643_v51 = vadd.f32 %v1037_v57, %v632_v50 }
  0xf2   : > { %v650_v52 = vmax.f32 %v643_v51, 0.0 }
  0xf3   : > { %v544_v53 = vpop.f32.mrf.mxu2  ;;  %v610_v54 = vpop.f32.mrf.mxu3 }
  0xf4   : > { %v657_v55 = vpack.c.bf16 %v650_v52, %v650_v52 }
  0xf6   : > { %664 = vst [vmem:[%s1044_s17 + $0x18] sm:$0xf] %v657_v55 }
  0xf7 PF: > { %p10_p9 = scmp.ge.s32.totalorder %s951_s16, 9   ;;  %s1069_s12 = smov %s907_s13 }
  0xf8   : > { %s1070_s13 = smov %s960_s19  ;;  %s1071_s14 = smov %s951_s16 }
  0xf9   :  { %12 = sbr.rel (!%p10_p9) target bundleno = 2 (0x2), region = 111 }

// kernel: convnet_forward.4
= control target key start
LH: loop header
LB: loop body
LE: loop exit
PB: predicated region body
PF: predicated region fallthrough
CT: control target
= control target key end

     0   :  { %vm368_vm0 = vcmask 130048   ;;  %s3517_s1 = inlined_call_operand.vmem [shape: bf16[400,128], index: 1, kind: input, shape index: {}]   ;;  %s3518_s0 = inlined_call_operand.vmem [shape: bf16[4,98,400], index: 0, kind: input, shape index: {}]   ;;  %s3519_s2 = inlined_call_operand.vmem [shape: f32[1,128], index: 2, kind: input, shape index: {}]   ;;  %s3520_s3 = inlined_call_operand.vmem [shape: bf16[98,128], index: 3, kind: output, shape index: {}]  }
   0x1   :  { %v2472_v0 = vld [vmem:[%s3517_s1 + $0x38] sm:$0xff]  ;;  %v2489_v3 = vld [vmem:[%s3517_s1 + $0x30] sm:$0xff]  ;;  %v2505_v6 = vld [vmem:[%s3517_s1 + $0xc0] sm:$0xff] }
   0x2   :  { %v2477_v1 = vld [vmem:[%s3517_s1 + $0x78] sm:$0xff]  ;;  %390 = vmatpush.bf16.msra.mxu0 %v2472_v0  ;;  %v2494_v4 = vld [vmem:[%s3517_s1 + $0x70] sm:$0xff]  ;;  %v2293_v7 = vld [vmem:[%s3518_s0 + $0xc] sm:$0xf]  ;;  %526 = vmatpush.bf16.msra.mxu3 %v2505_v6 }
   0x3   :  { %v2482_v2 = vld [vmem:[%s3517_s1 + $0xb8] sm:$0xff]  ;;  %433 = vmatpush.bf16.msra.mxu1 %v2477_v1  ;;  %v2500_v5 = vld [vmem:[%s3517_s1 + $0xb0] sm:$0xff]  ;;  %v2518_v9 = vld [vmem:[%s3517_s1 + $0x28] sm:$0xff] }
   0x4   :  { %476 = vmatpush.bf16.msra.mxu2 %v2482_v2  ;;  %v1714_v8 = vld [vmem:[%s3518_s0 + $0x18] sm:$0xf0]  ;;  %v2523_v10 = vld [vmem:[%s3517_s1 + $0x68] sm:$0xff]  ;;  %v2538_v13 = vld [vmem:[%s3517_s1 + $0x20] sm:$0xff] }
   0x5   :  { %v2529_v11 = vld [vmem:[%s3517_s1 + $0xa8] sm:$0xff]  ;;  %v1717_v12 = vor.u32 %v2293_v7, %v1714_v8  ;;  %v2543_v14 = vld [vmem:[%s3517_s1 + $0x60] sm:$0xff]  ;;  %v2558_v16 = vld [vmem:[%s3517_s1 + $0x18] sm:$0xff] }
   0x6   :  { %391 = vmatpush.bf16.msra.mxu0 %v2489_v3  ;;  %737 = vmatpush.bf16.msrb.mxu3 %v2472_v0  ;;  %v2549_v15 = vld [vmem:[%s3517_s1 + $0xa0] sm:$0xff]  ;;  %v2563_v17 = vld [vmem:[%s3517_s1 + $0x58] sm:$0xff]  ;;  %v2577_v19 = vld [vmem:[%s3517_s1 + $0x10] sm:$0xff] }
   0x7   :  { %434 = vmatpush.bf16.msra.mxu1 %v2494_v4  ;;  %1898 = vmatmul.msk.bf16.vlgmr.msra.gmra.mxu3 %vm368_vm0, %v1717_v12  ;;  %v2569_v18 = vld [vmem:[%s3517_s1 + $0x98] sm:$0xff]  ;;  %v2582_v20 = vld [vmem:[%s3517_s1 + $0x50] sm:$0xff]  ;;  %v2297_v22 = vld [vmem:[%s3518_s0 + $0x2c] sm:$0xf] }
   0x8   :  { %477 = vmatpush.bf16.msra.mxu2 %v2500_v5  ;;  %v2588_v21 = vld [vmem:[%s3517_s1 + $0x90] sm:$0xff]  ;;  %v1730_v23 = vld [vmem:[%s3518_s0 + $0x38] sm:$0xf0]  ;;  %v2602_v24 = vld [vmem:[%s3517_s1 + $0x8] sm:$0xff] }
   0x9   :  { %v2607_v25 = vld [vmem:[%s3517_s1 + $0x48] sm:$0xff]  ;;  %v1733_v27 = vor.u32 %v2297_v22, %v1730_v23  ;;  %v2619_v28 = vld [vmem:[%s3517_s1] sm:$0xff]  ;;  %v2294_v31 = vld [vmem:[%s3518_s0 + $0xc] sm:$0xf0] }
   0xa   :  { %392 = vmatpush.bf16.msra.mxu0 %v2518_v9  ;;  %738 = vmatpush.bf16.msrb.mxu3 %v2489_v3  ;;  %v2613_v26 = vld [vmem:[%s3517_s1 + $0x88] sm:$0xff]  ;;  %v2624_v29 = vld [vmem:[%s3517_s1 + $0x40] sm:$0xff]  ;;  %v1706_v33 = vld [vmem:[%s3518_s0 + $0x10] sm:$0xf0] }
   0xb   :  { %435 = vmatpush.bf16.msra.mxu1 %v2523_v10  ;;  %v1704_v30 = vld [vmem:[%s3518_s0] sm:$0xf]  ;;  %v2292_v32 = vld [vmem:[%s3518_s0 + $0x4] sm:$0xf]  ;;  %v1712_v35 = vld [vmem:[%s3518_s0 + $0x8] sm:$0xf] }
   0xc   :  { %478 = vmatpush.bf16.msra.mxu2 %v2529_v11  ;;  %v2644_v34 = vld [vmem:[%s3517_s1 + $0x80] sm:$0xff]  ;;  %v2295_v36 = vld [vmem:[%s3518_s0 + $0x14] sm:$0xf0]  ;;  %v1705_v37 = vor.u32 %v2294_v31, %v1704_v30  ;;  %v1709_v38 = vor.u32 %v2292_v32, %v1706_v33  ;;  %v2301_v40 = vld [vmem:[%s3518_s0 + $0x4c] sm:$0xf] }
   0xd   :  { %v1713_v39 = vor.u32 %v2295_v36, %v1712_v35  ;;  %v1746_v41 = vld [vmem:[%s3518_s0 + $0x58] sm:$0xf0]  ;;  %v1720_v43 = vld [vmem:[%s3518_s0 + $0x20] sm:$0xf]  ;;  %v2298_v44 = vld [vmem:[%s3518_s0 + $0x2c] sm:$0xf0] }
   0xe   :  { %393 = vmatpush.bf16.msra.mxu0 %v2538_v13  ;;  %739 = vmatpush.bf16.msrb.mxu3 %v2518_v9  ;;  %v1749_v42 = vor.u32 %v2301_v40, %v1746_v41  ;;  %v2296_v45 = vld [vmem:[%s3518_s0 + $0x24] sm:$0xf]  ;;  %v1722_v46 = vld [vmem:[%s3518_s0 + $0x30] sm:$0xf0]  ;;  %v1728_v47 = vld [vmem:[%s3518_s0 + $0x28] sm:$0xf]  ;;  %v1721_v49 = vor.u32 %v2298_v44, %v1720_v43 }
   0xf   :  { %436 = vmatpush.bf16.msra.mxu1 %v2543_v14  ;;  %v2299_v48 = vld [vmem:[%s3518_s0 + $0x34] sm:$0xf0]  ;;  %v1725_v50 = vor.u32 %v2296_v45, %v1722_v46  ;;  %v2305_v52 = vld [vmem:[%s3518_s0 + $0x6c] sm:$0xf]  ;;  %v1762_v53 = vld [vmem:[%s3518_s0 + $0x78] sm:$0xf0] }
  0x10   :  { %479 = vmatpush.bf16.msra.mxu2 %v2549_v15  ;;  %v1729_v51 = vor.u32 %v2299_v48, %v1728_v47  ;;  %v1765_v54 = vor.u32 %v2305_v52, %v1762_v53  ;;  %v1736_v55 = vld [vmem:[%s3518_s0 + $0x40] sm:$0xf]  ;;  %v2302_v56 = vld [vmem:[%s3518_s0 + $0x4c] sm:$0xf0]  ;;  %v2300_v57 = vld [vmem:[%s3518_s0 + $0x44] sm:$0xf] }
  0x11   :  { %v1738_v58 = vld [vmem:[%s3518_s0 + $0x50] sm:$0xf0]  ;;  %v1744_v59 = vld [vmem:[%s3518_s0 + $0x48] sm:$0xf]  ;;  %v2303_v60 = vld [vmem:[%s3518_s0 + $0x54] sm:$0xf0]  ;;  %v1737_v61 = vor.u32 %v2302_v56, %v1736_v55 }
  0x12   :  { %394 = vmatpush.bf16.msra.mxu0 %v2558_v16  ;;  %740 = vmatpush.bf16.msrb.mxu3 %v2538_v13  ;;  %v1741_v62 = vor.u32 %v2300_v57, %v1738_v58  ;;  %v1745_v63 = vor.u32 %v2303_v60, %v1744_v59  ;;  %v2309_v7 = vld [vmem:[%s3518_s0 + $0x8c] sm:$0xf]  ;;  %v1778_v8 = vld [vmem:[%s3518_s0 + $0x98] sm:$0xf0]  ;;  %v1752_v22 = vld [vmem:[%s3518_s0 + $0x60] sm:$0xf] }
  0x13   :  { %437 = vmatpush.bf16.msra.mxu1 %v2563_v17  ;;  %v1781_v12 = vor.u32 %v2309_v7, %v1778_v8  ;;  %v2306_v23 = vld [vmem:[%s3518_s0 + $0x6c] sm:$0xf0]  ;;  %v1754_v30 = vld [vmem:[%s3518_s0 + $0x70] sm:$0xf0]  ;;  %v1760_v31 = vld [vmem:[%s3518_s0 + $0x68] sm:$0xf] }
  0x14   :  { %480 = vmatpush.bf16.msra.mxu2 %v2569_v18  ;;  %v2307_v32 = vld [vmem:[%s3518_s0 + $0x74] sm:$0xf0]  ;;  %v1753_v33 = vor.u32 %v2306_v23, %v1752_v22  ;;  %v1768_v40 = vld [vmem:[%s3518_s0 + $0x80] sm:$0xf]  ;;  %v2310_v41 = vld [vmem:[%s3518_s0 + $0x8c] sm:$0xf0] }
  0x15   :  { %v1761_v36 = vor.u32 %v2307_v32, %v1760_v31  ;;  %v1770_v43 = vld [vmem:[%s3518_s0 + $0x90] sm:$0xf0]  ;;  %v1776_v44 = vld [vmem:[%s3518_s0 + $0x88] sm:$0xf]  ;;  %v2311_v45 = vld [vmem:[%s3518_s0 + $0x94] sm:$0xf0]  ;;  %v1769_v46 = vor.u32 %v2310_v41, %v1768_v40 }
  0x16   :  { %395 = vmatpush.bf16.msra.mxu0 %v2577_v19  ;;  %741 = vmatpush.bf16.msrb.mxu3 %v2558_v16  ;;  %v1777_v48 = vor.u32 %v2311_v45, %v1776_v44  ;;  %v1784_v52 = vld [vmem:[%s3518_s0 + $0xa0] sm:$0xf]  ;;  %v2314_v53 = vld [vmem:[%s3518_s0 + $0xac] sm:$0xf0]  ;;  %v1786_v55 = vld [vmem:[%s3518_s0 + $0xb0] sm:$0xf0] }
  0x17   :  { %438 = vmatpush.bf16.msra.mxu1 %v2582_v20  ;;  %1899 = vmatmul.msk.bf16.gmra.mxu3 %vm368_vm0, %v1733_v27  ;;  %v2304_v27 = vld [vmem:[%s3518_s0 + $0x64] sm:$0xf]  ;;  %v1792_v56 = vld [vmem:[%s3518_s0 + $0xa8] sm:$0xf]  ;;  %v2315_v57 = vld [vmem:[%s3518_s0 + $0xb4] sm:$0xf0]  ;;  %v1785_v58 = vor.u32 %v2314_v53, %v1784_v52 }
  0x18   :  { %481 = vmatpush.bf16.msra.mxu2 %v2588_v21  ;;  %v1757_v35 = vor.u32 %v2304_v27, %v1754_v30  ;;  %v1793_v60 = vor.u32 %v2315_v57, %v1792_v56  ;;  %v1949_v31 = vld [vmem:[%s3518_s0 + $0xf0] sm:$0xf]  ;;  %v2347_v32 = vld [vmem:[%s3518_s0 + $0xfc] sm:$0xf0]  ;;  %v1975_v56 = vld [vmem:[%s3518_s0 + $0x128] sm:$0xf0] }
  0x19   :  { %v2351_v41 = vld [vmem:[%s3518_s0 + $0x11c] sm:$0xf0] }
  0x1a   :  { %396 = vmatpush.bf16.msra.mxu0 %v2602_v24  ;;  %742 = vmatpush.bf16.msrb.mxu3 %v2577_v19 }
  0x1b   :  { %439 = vmatpush.bf16.msra.mxu1 %v2607_v25 }
  0x1c   :  { %482 = vmatpush.bf16.msra.mxu2 %v2613_v26 }
  0x1e   :  { %397 = vmatpush.bf16.msra.mxu0 %v2619_v28  ;;  %743 = vmatpush.bf16.msrb.mxu3 %v2602_v24 }
  0x1f   :  { %440 = vmatpush.bf16.msra.mxu1 %v2624_v29 }
  0x20   :  { %483 = vmatpush.bf16.msra.mxu2 %v2644_v34 }
  0x21   :  { %398 = vmatmul.bf16.vlgmr.msra.gmra.mxu0 %v1705_v37  ;;  %v2313_v37 = vld [vmem:[%s3518_s0 + $0xac] sm:$0xf] }
  0x22   :  { %780 = vmatpush.bf16.msrb.mxu0 %v2477_v1  ;;  %441 = vmatmul.bf16.vlgmr.msra.gmra.mxu1 %v1709_v38  ;;  %v1794_v38 = vld [vmem:[%s3518_s0 + $0xb8] sm:$0xf0] }
  0x23   :  { %823 = vmatpush.bf16.msrb.mxu1 %v2482_v2  ;;  %484 = vmatmul.bf16.vlgmr.msra.gmra.mxu2 %v1713_v39  ;;  %v1797_v39 = vor.u32 %v2313_v37, %v1794_v38 }
  0x24   :  { %873 = vmatpush.bf16.msrb.mxu2 %v2505_v6  ;;  %744 = vmatpush.bf16.msrb.mxu3 %v2619_v28 }
  0x26   :  { %781 = vmatpush.bf16.msrb.mxu0 %v2494_v4 }
  0x27   :  { %824 = vmatpush.bf16.msrb.mxu1 %v2500_v5  ;;  %1900 = vmatmul.msk.bf16.gmra.mxu3 %vm368_vm0, %v1749_v42  ;;  %v2308_v42 = vld [vmem:[%s3518_s0 + $0x84] sm:$0xf] }
  0x28   :  { %1220 = vmatpush.bf16.msra.mxu2 %v2505_v6  ;;  %1084 = vmatpush.bf16.msra.mxu3 %v2472_v0  ;;  %v1773_v47 = vor.u32 %v2308_v42, %v1770_v43 }
  0x2a   :  { %782 = vmatpush.bf16.msrb.mxu0 %v2523_v10 }
  0x2b   :  { %825 = vmatpush.bf16.msrb.mxu1 %v2529_v11 }
  0x2c   :  { %1085 = vmatpush.bf16.msra.mxu3 %v2489_v3 }
  0x2e   :  { %783 = vmatpush.bf16.msrb.mxu0 %v2543_v14 }
  0x2f   :  { %826 = vmatpush.bf16.msrb.mxu1 %v2549_v15 }
  0x30   :  { %1086 = vmatpush.bf16.msra.mxu3 %v2518_v9 }
  0x31   :  { %403 = vmatmul.bf16.gmra.mxu0 %v1721_v49  ;;  %v40_v49 = vld [vmem:[%s3518_s0 + $0xc8] sm:$0x11] }
  0x32   :  { %784 = vmatpush.bf16.msrb.mxu0 %v2563_v17  ;;  %446 = vmatmul.bf16.gmra.mxu1 %v1725_v50  ;;  %v168_v50 = vunpack.c.h.b16 %v40_v49  ;;  %v167_v22 = vunpack.c.l.b16 %v40_v49 }
  0x33   :  { %827 = vmatpush.bf16.msrb.mxu1 %v2569_v18  ;;  %489 = vmatmul.bf16.gmra.mxu2 %v1729_v51 }
  0x34   :  { %1087 = vmatpush.bf16.msra.mxu3 %v2538_v13  ;;  %v196_v51 = vpack.c.b16 %v168_v50, %v168_v50  ;;  %v195_v30 = vpack.c.b16 %v167_v22, %v167_v22 }
  0x36   :  { %785 = vmatpush.bf16.msrb.mxu0 %v2582_v20 }
  0x37   :  { %828 = vmatpush.bf16.msrb.mxu1 %v2588_v21  ;;  %1901 = vmatmul.msk.bf16.gmra.mxu3 %vm368_vm0, %v1765_v54  ;;  %v2312_v54 = vld [vmem:[%s3518_s0 + $0xa4] sm:$0xf] }
  0x38   :  { %1088 = vmatpush.bf16.msra.mxu3 %v2558_v16  ;;  %v1789_v59 = vor.u32 %v2312_v54, %v1786_v55  ;;  %v1967_v54 = vld [vmem:[%s3518_s0 + $0x120] sm:$0xf0]  ;;  %v1973_v55 = vld [vmem:[%s3518_s0 + $0x118] sm:$0xf] }
  0x3a   :  { %786 = vmatpush.bf16.msrb.mxu0 %v2607_v25 }
  0x3b   :  { %829 = vmatpush.bf16.msrb.mxu1 %v2613_v26 }
  0x3c   :  { %1089 = vmatpush.bf16.msra.mxu3 %v2577_v19 }
  0x3e   :  { %787 = vmatpush.bf16.msrb.mxu0 %v2624_v29 }
  0x3f   :  { %830 = vmatpush.bf16.msrb.mxu1 %v2644_v34 }
  0x40   :  { %1090 = vmatpush.bf16.msra.mxu3 %v2602_v24 }
  0x41   :  { %408 = vmatmul.bf16.gmra.mxu0 %v1737_v61  ;;  %v1933_v61 = vld [vmem:[%s3518_s0 + $0xd0] sm:$0xf] }
  0x42   :  { %1127 = vmatpush.bf16.msra.mxu0 %v2477_v1  ;;  %451 = vmatmul.bf16.gmra.mxu1 %v1741_v62  ;;  %v2343_v62 = vld [vmem:[%s3518_s0 + $0xdc] sm:$0xf0] }
  0x43   :  { %1170 = vmatpush.bf16.msra.mxu1 %v2482_v2  ;;  %494 = vmatmul.bf16.gmra.mxu2 %v1745_v63  ;;  %v39_v63 = vld [vmem:[%s3518_s0 + $0xc0] sm:$0x11]  ;;  %v1934_v7 = vor.u32 %v2343_v62, %v1933_v61 }
  0x44   :  { %1091 = vmatpush.bf16.msra.mxu3 %v2619_v28  ;;  %v165_v8 = vunpack.c.l.b16 %v39_v63 }
  0x46   :  { %1128 = vmatpush.bf16.msra.mxu0 %v2494_v4  ;;  %v193_v23 = vpack.c.b16 %v165_v8, %v165_v8 }
  0x47   :  { %1171 = vmatpush.bf16.msra.mxu1 %v2500_v5  ;;  %1902 = vmatmul.msk.bf16.gmra.mxu3 %vm368_vm0, %v1781_v12  ;;  %v166_v12 = vunpack.c.h.b16 %v39_v63 }
  0x49   :  { %v194_v27 = vpack.c.b16 %v166_v12, %v166_v12  ;;  %v2359_v12 = vld [vmem:[%s3518_s0 + $0x15c] sm:$0xf0] }
  0x4a   :  { %1129 = vmatpush.bf16.msra.mxu0 %v2523_v10 }
  0x4b   :  { %1172 = vmatpush.bf16.msra.mxu1 %v2529_v11 }
  0x4e   :  { %1130 = vmatpush.bf16.msra.mxu0 %v2543_v14 }
  0x4f   :  { %1173 = vmatpush.bf16.msra.mxu1 %v2549_v15 }
  0x51   :  { %413 = vmatmul.bf16.gmra.mxu0 %v1753_v33  ;;  %v1950_v33 = vor.u32 %v2347_v32, %v1949_v31 }
  0x52   :  { %1131 = vmatpush.bf16.msra.mxu0 %v2563_v17  ;;  %456 = vmatmul.bf16.gmra.mxu1 %v1757_v35  ;;  %v1941_v35 = vld [vmem:[%s3518_s0 + $0xd8] sm:$0xf] }
  0x53   :  { %1174 = vmatpush.bf16.msra.mxu1 %v2569_v18  ;;  %499 = vmatmul.bf16.gmra.mxu2 %v1761_v36  ;;  %v2344_v36 = vld [vmem:[%s3518_s0 + $0xe4] sm:$0xf0] }
  0x54   :  { %v1942_v38 = vor.u32 %v2344_v36, %v1941_v35  ;;  %v2356_v35 = vld [vmem:[%s3518_s0 + $0x144] sm:$0xf0]  ;;  %v2354_v36 = vld [vmem:[%s3518_s0 + $0x13c] sm:$0xf] }
  0x56   :  { %1132 = vmatpush.bf16.msra.mxu0 %v2582_v20 }
  0x57   :  { %1175 = vmatpush.bf16.msra.mxu1 %v2588_v21  ;;  %1903 = vmatmul.msk.bf16.gmra.mxu3 %vm368_vm0, %v1797_v39 }
  0x5a   :  { %1133 = vmatpush.bf16.msra.mxu0 %v2607_v25 }
  0x5b   :  { %1176 = vmatpush.bf16.msra.mxu1 %v2613_v26 }
  0x5e   :  { %1134 = vmatpush.bf16.msra.mxu0 %v2624_v29 }
  0x5f   :  { %1177 = vmatpush.bf16.msra.mxu1 %v2644_v34 }
  0x61   :  { %418 = vmatmul.bf16.gmra.mxu0 %v1769_v46 }
  0x62   :  { %461 = vmatmul.bf16.gmra.mxu1 %v1773_v47 }
  0x63   :  { %504 = vmatmul.bf16.gmra.mxu2 %v1777_v48 }
  0x67   :  { %1904 = vmatmul.msk.bf16.gmra.mxu3 %vm368_vm0, %v196_v51 }
  0x71   :  { %423 = vmatmul.bf16.gmra.mxu0 %v1785_v58 }
  0x72   :  { %466 = vmatmul.bf16.gmra.mxu1 %v1789_v59 }
  0x73   :  { %509 = vmatmul.bf16.gmra.mxu2 %v1793_v60 }
  0x77   :  { %745 = vmatmul.bf16.vlgmr.msrb.gmra.mxu3 %v1934_v7 }
  0x78   :  { %1431 = vmatpush.bf16.msrb.mxu3 %v2472_v0  ;;  %v2341_v0 = vld [vmem:[%s3518_s0 + $0xd4] sm:$0xf] }
  0x7c   :  { %1432 = vmatpush.bf16.msrb.mxu3 %v2489_v3  ;;  %v1935_v3 = vld [vmem:[%s3518_s0 + $0xe0] sm:$0xf0] }
  0x7d   :  { %v1938_v37 = vor.u32 %v2341_v0, %v1935_v3  ;;  %v1983_v0 = vld [vmem:[%s3518_s0 + $0x140] sm:$0xf0]  ;;  %v1989_v3 = vld [vmem:[%s3518_s0 + $0x138] sm:$0xf] }
  0x80   :  { %1433 = vmatpush.bf16.msrb.mxu3 %v2518_v9  ;;  %v2342_v9 = vld [vmem:[%s3518_s0 + $0xdc] sm:$0xf] }
  0x81   :  { %428 = vmatmul.bf16.gmra.mxu0 %v193_v23 }
  0x82   :  { %471 = vmatmul.bf16.gmra.mxu1 %v194_v27 }
  0x83   :  { %514 = vmatmul.bf16.gmra.mxu2 %v195_v30 }
  0x84   :  { %1434 = vmatpush.bf16.msrb.mxu3 %v2538_v13  ;;  %v1943_v13 = vld [vmem:[%s3518_s0 + $0xe8] sm:$0xf0] }
  0x85   :  { %v1946_v39 = vor.u32 %v2342_v9, %v1943_v13  ;;  %v1991_v9 = vld [vmem:[%s3518_s0 + $0x148] sm:$0xf0] }
  0x87   :  { %750 = vmatmul.bf16.gmra.mxu3 %v1950_v33  ;;  %v2353_v33 = vld [vmem:[%s3518_s0 + $0x134] sm:$0xf] }
  0x88   :  { %1435 = vmatpush.bf16.msrb.mxu3 %v2558_v16  ;;  %v1965_v16 = vld [vmem:[%s3518_s0 + $0x110] sm:$0xf] }
  0x89   :  { %v1966_v42 = vor.u32 %v2351_v41, %v1965_v16  ;;  %v1994_v41 = vor.u32 %v2354_v36, %v1991_v9 }
  0x8a   :  { %v528_v40 = vpop.f32.mrf.mxu3 }
  0x8c   :  { %1436 = vmatpush.bf16.msrb.mxu3 %v2577_v19 }
  0x90   :  { %1437 = vmatpush.bf16.msrb.mxu3 %v2602_v24  ;;  %v1959_v24 = vld [vmem:[%s3518_s0 + $0x108] sm:$0xf0] }
  0x91   :  { %788 = vmatmul.bf16.vlgmr.msrb.gmra.mxu0 %v1938_v37  ;;  %v1986_v37 = vor.u32 %v2353_v33, %v1983_v0 }
  0x92   :  { %831 = vmatmul.bf16.vlgmr.msrb.gmra.mxu1 %v1942_v38  ;;  %1474 = vmatpush.bf16.msrb.mxu0 %v2477_v1  ;;  %v530_v19 = vpop.f32.mrf.mxu3  ;;  %v2345_v1 = vld [vmem:[%s3518_s0 + $0xf4] sm:$0xf]  ;;  %v1990_v38 = vor.u32 %v2356_v35, %v1989_v3 }
  0x93   :  { %2027 = vmatmul.msk.bf16.vlgmr.msrb.gmra.mxu2 %vm368_vm0, %v1946_v39  ;;  %1517 = vmatpush.bf16.msrb.mxu1 %v2482_v2  ;;  %v1951_v2 = vld [vmem:[%s3518_s0 + $0x100] sm:$0xf0] }
  0x94   :  { %1567 = vmatpush.bf16.msrb.mxu2 %v2505_v6  ;;  %1438 = vmatpush.bf16.msrb.mxu3 %v2619_v28  ;;  %v1957_v6 = vld [vmem:[%s3518_s0 + $0xf8] sm:$0xf]  ;;  %v1954_v28 = vor.u32 %v2345_v1, %v1951_v2  ;;  %v2013_v2 = vld [vmem:[%s3518_s0 + $0x170] sm:$0xf] }
  0x96   :  { %1475 = vmatpush.bf16.msrb.mxu0 %v2494_v4  ;;  %v2348_v4 = vld [vmem:[%s3518_s0 + $0x104] sm:$0xf0] }
  0x97   :  { %1518 = vmatpush.bf16.msrb.mxu1 %v2500_v5  ;;  %v2346_v5 = vld [vmem:[%s3518_s0 + $0xfc] sm:$0xf]  ;;  %755 = vmatmul.bf16.gmra.mxu3 %v1966_v42  ;;  %v1958_v43 = vor.u32 %v2348_v4, %v1957_v6  ;;  %v2363_v6 = vld [vmem:[%s3518_s0 + $0x17c] sm:$0xf0] }
  0x98   :  { %v1962_v46 = vor.u32 %v2346_v5, %v1959_v24 }
  0x9a   :  { %1476 = vmatpush.bf16.msrb.mxu0 %v2523_v10  ;;  %v533_v10 = vpop.f32.mrf.mxu3 }
  0x9b   :  { %1519 = vmatpush.bf16.msrb.mxu1 %v2529_v11  ;;  %v1981_v11 = vld [vmem:[%s3518_s0 + $0x130] sm:$0xf] }
  0x9e   :  { %v399_v44 = vpop.f32.mrf.mxu0  ;;  %1477 = vmatpush.bf16.msrb.mxu0 %v2543_v14  ;;  %v2355_v14 = vld [vmem:[%s3518_s0 + $0x13c] sm:$0xf0] }
  0x9f   :  { %v442_v45 = vpop.f32.mrf.mxu1  ;;  %1520 = vmatpush.bf16.msrb.mxu1 %v2549_v15  ;;  %v1982_v53 = vor.u32 %v2355_v14, %v1981_v11  ;;  %v2005_v11 = vld [vmem:[%s3518_s0 + $0x158] sm:$0xf]  ;;  %v2360_v14 = vld [vmem:[%s3518_s0 + $0x164] sm:$0xf0] }
  0xa0   :  { %v443_v47 = vadd.f32 %v442_v45, %v399_v44  ;;  %v2014_v45 = vor.u32 %v2363_v6, %v2013_v2 }
  0xa1   :  { %793 = vmatmul.bf16.gmra.mxu0 %v1954_v28 }
  0xa2   :  { %836 = vmatmul.bf16.gmra.mxu1 %v1958_v43  ;;  %1478 = vmatpush.bf16.msrb.mxu0 %v2563_v17  ;;  %v535_v52 = vpop.f32.mrf.mxu3 }
  0xa3   :  { %2028 = vmatmul.msk.bf16.gmra.mxu2 %vm368_vm0, %v1962_v46  ;;  %1521 = vmatpush.bf16.msrb.mxu1 %v2569_v18  ;;  %v2349_v18 = vld [vmem:[%s3518_s0 + $0x114] sm:$0xf] }
  0xa4   :  { %v1970_v58 = vor.u32 %v2349_v18, %v1967_v54 }
  0xa6   :  { %v485_v48 = vpop.f32.mrf.mxu2  ;;  %v401_v50 = vpop.f32.mrf.mxu0  ;;  %1479 = vmatpush.bf16.msrb.mxu0 %v2582_v20  ;;  %v2352_v20 = vld [vmem:[%s3518_s0 + $0x124] sm:$0xf0] }
  0xa7   :  { %v486_v49 = vadd.f32 %v485_v48, %v443_v47  ;;  %v444_v15 = vpop.f32.mrf.mxu1  ;;  %1522 = vmatpush.bf16.msrb.mxu1 %v2588_v21  ;;  %v2350_v21 = vld [vmem:[%s3518_s0 + $0x11c] sm:$0xf]  ;;  %760 = vmatmul.bf16.gmra.mxu3 %v1982_v53  ;;  %v1974_v59 = vor.u32 %v2352_v20, %v1973_v55  ;;  %v2357_v47 = vld [vmem:[%s3518_s0 + $0x154] sm:$0xf] }
  0xa8   :  { %v445_v51 = vadd.f32 %v444_v15, %v401_v50  ;;  %v1978_v63 = vor.u32 %v2350_v21, %v1975_v56  ;;  %v2358_v48 = vld [vmem:[%s3518_s0 + $0x15c] sm:$0xf]  ;;  %v1929_v56 = vld [vmem:[%s3518_s0 + $0x190] sm:$0x11] }
  0xa9   :  { %v2909_v17 = vadd.f32 %v528_v40, %v486_v49  ;;  %v2007_v49 = vld [vmem:[%s3518_s0 + $0x168] sm:$0xf0] }
  0xaa   :  { %1480 = vmatpush.bf16.msrb.mxu0 %v2607_v25  ;;  %v538_v7 = vpop.f32.mrf.mxu3  ;;  %v2010_v54 = vor.u32 %v2358_v48, %v2007_v49 }
  0xab   :  { %1523 = vmatpush.bf16.msrb.mxu1 %v2613_v26  ;;  %v1997_v26 = vld [vmem:[%s3518_s0 + $0x150] sm:$0xf] }
  0xac   :  { %v1998_v31 = vor.u32 %v2359_v12, %v1997_v26  ;;  %v2361_v26 = vld [vmem:[%s3518_s0 + $0x174] sm:$0xf]  ;;  %v2015_v12 = vld [vmem:[%s3518_s0 + $0x180] sm:$0xf0] }
  0xae   :  { %v487_v57 = vpop.f32.mrf.mxu2  ;;  %v404_v61 = vpop.f32.mrf.mxu0  ;;  %1481 = vmatpush.bf16.msrb.mxu0 %v2624_v29 }
  0xaf   :  { %v488_v60 = vadd.f32 %v487_v57, %v445_v51  ;;  %v447_v62 = vpop.f32.mrf.mxu1  ;;  %1524 = vmatpush.bf16.msrb.mxu1 %v2644_v34  ;;  %v2006_v51 = vor.u32 %v2360_v14, %v2005_v11  ;;  %v663_v57 = vunpack.c.l.b16 %v1929_v56 }
  0xb0   :  { %v448_v25 = vadd.f32 %v447_v62, %v404_v61 }
  0xb1   :  { %v2933_v8 = vadd.f32 %v530_v19, %v488_v60  ;;  %798 = vmatmul.bf16.gmra.mxu0 %v1970_v58 }
  0xb2   :  { %841 = vmatmul.bf16.gmra.mxu1 %v1974_v59  ;;  %v540_v34 = vpop.f32.mrf.mxu3 }
  0xb3   :  { %2029 = vmatmul.msk.bf16.gmra.mxu2 %vm368_vm0, %v1978_v63 }
  0xb6   :  { %v490_v22 = vpop.f32.mrf.mxu2  ;;  %v406_v23 = vpop.f32.mrf.mxu0 }
  0xb7   :  { %v491_v29 = vadd.f32 %v490_v22, %v448_v25  ;;  %v449_v27 = vpop.f32.mrf.mxu1  ;;  %765 = vmatmul.bf16.gmra.mxu3 %v1998_v31  ;;  %v691_v25 = vpack.c.b16 %v663_v57, %v663_v57  ;;  %v2021_v22 = vld [vmem:[%s3518_s0 + $0x178] sm:$0xf] }
  0xb8   :  { %v450_v30 = vadd.f32 %v449_v27, %v406_v23  ;;  %v2362_v23 = vld [vmem:[%s3518_s0 + $0x17c] sm:$0xf]  ;;  %v2023_v27 = vld [vmem:[%s3518_s0 + $0x188] sm:$0xf0] }
  0xb9   :  { %v2942_v32 = vadd.f32 %v533_v10, %v491_v29  ;;  %v1999_v10 = vld [vmem:[%s3518_s0 + $0x160] sm:$0xf0]  ;;  %v2364_v29 = vld [vmem:[%s3518_s0 + $0x184] sm:$0xf0]  ;;  %v2026_v35 = vor.u32 %v2362_v23, %v2023_v27 }
  0xba   :  { %v543_v42 = vpop.f32.mrf.mxu3  ;;  %v2002_v15 = vor.u32 %v2357_v47, %v1999_v10  ;;  %v2022_v31 = vor.u32 %v2364_v29, %v2021_v22 }
  0xbe   :  { %v492_v13 = vpop.f32.mrf.mxu2  ;;  %v409_v40 = vpop.f32.mrf.mxu0 }
  0xbf   :  { %v493_v39 = vadd.f32 %v492_v13, %v450_v30  ;;  %v452_v16 = vpop.f32.mrf.mxu1 }
  0xc0   :  { %v453_v19 = vadd.f32 %v452_v16, %v409_v40 }
  0xc1   :  { %v2962_v1 = vadd.f32 %v535_v52, %v493_v39  ;;  %803 = vmatmul.bf16.gmra.mxu0 %v1986_v37  ;;  %v2062_v37 = vld [vmem:[%s3518_s0 + $0x1a0] sm:$0xf] }
  0xc2   :  { %846 = vmatmul.bf16.gmra.mxu1 %v1990_v38  ;;  %v545_v44 = vpop.f32.mrf.mxu3  ;;  %v2367_v38 = vld [vmem:[%s3518_s0 + $0x1ac] sm:$0xf0] }
  0xc3   :  { %2030 = vmatmul.msk.bf16.gmra.mxu2 %vm368_vm0, %v1994_v41  ;;  %v2063_v6 = vor.u32 %v2367_v38, %v2062_v37 }
  0xc6   :  { %v495_v4 = vpop.f32.mrf.mxu2  ;;  %v411_v24 = vpop.f32.mrf.mxu0 }
  0xc7   :  { %v496_v5 = vadd.f32 %v495_v4, %v453_v19  ;;  %v454_v28 = vpop.f32.mrf.mxu1  ;;  %770 = vmatmul.bf16.gmra.mxu3 %v2014_v45  ;;  %v1930_v19 = vld [vmem:[%s3518_s0 + $0x198] sm:$0x11] }
  0xc8   :  { %v455_v43 = vadd.f32 %v454_v28, %v411_v24  ;;  %v665_v24 = vunpack.c.l.b16 %v1930_v19  ;;  %v666_v28 = vunpack.c.h.b16 %v1930_v19  ;;  %v2372_v19 = vld [vmem:[%s3518_s0 + $0x1d4] sm:$0xf0] }
  0xc9   :  { %v2971_v46 = vadd.f32 %v538_v7, %v496_v5  ;;  %v664_v5 = vunpack.c.h.b16 %v1929_v56 }
  0xca   :  { %v548_v20 = vpop.f32.mrf.mxu3  ;;  %v693_v45 = vpack.c.b16 %v665_v24, %v665_v24  ;;  %v694_v14 = vpack.c.b16 %v666_v28, %v666_v28 }
  0xce   :  { %v497_v50 = vpop.f32.mrf.mxu2  ;;  %v414_v53 = vpop.f32.mrf.mxu0 }
  0xcf   :  { %v498_v52 = vadd.f32 %v497_v50, %v455_v43  ;;  %v457_v18 = vpop.f32.mrf.mxu1 }
  0xd0   :  { %v458_v55 = vadd.f32 %v457_v18, %v414_v53 }
  0xd1   :  { %v2991_v21 = vadd.f32 %v540_v34, %v498_v52  ;;  %808 = vmatmul.bf16.gmra.mxu0 %v2002_v15  ;;  %v2018_v34 = vor.u32 %v2361_v26, %v2015_v12  ;;  %v2078_v15 = vld [vmem:[%s3518_s0 + $0x1c0] sm:$0xf] }
  0xd2   :  { %851 = vmatmul.bf16.gmra.mxu1 %v2006_v51  ;;  %v550_v63 = vpop.f32.mrf.mxu3  ;;  %v2371_v51 = vld [vmem:[%s3518_s0 + $0x1cc] sm:$0xf0] }
  0xd3   :  { %2031 = vmatmul.msk.bf16.gmra.mxu2 %vm368_vm0, %v2010_v54  ;;  %v2079_v56 = vor.u32 %v2371_v51, %v2078_v15 }
  0xd6   :  { %v500_v58 = vpop.f32.mrf.mxu2  ;;  %v416_v60 = vpop.f32.mrf.mxu0 }
  0xd7   :  { %v501_v59 = vadd.f32 %v500_v58, %v458_v55  ;;  %v459_v61 = vpop.f32.mrf.mxu1  ;;  %775 = vmatmul.bf16.gmra.mxu3 %v691_v25  ;;  %v2365_v58 = vld [vmem:[%s3518_s0 + $0x1a4] sm:$0xf] }
  0xd8   :  { %v460_v62 = vadd.f32 %v459_v61, %v416_v60  ;;  %v2070_v60 = vld [vmem:[%s3518_s0 + $0x1a8] sm:$0xf]  ;;  %v2368_v61 = vld [vmem:[%s3518_s0 + $0x1b4] sm:$0xf0] }
  0xd9   :  { %v2997_v7 = vadd.f32 %v543_v42, %v501_v59  ;;  %v2064_v59 = vld [vmem:[%s3518_s0 + $0x1b0] sm:$0xf0]  ;;  %v2071_v12 = vor.u32 %v2368_v61, %v2070_v60  ;;  %v2374_v60 = vld [vmem:[%s3518_s0 + $0x1ec] sm:$0xf]  ;;  %v2104_v61 = vld [vmem:[%s3518_s0 + $0x1f8] sm:$0xf0] }
  0xda   :  { %v553_v9 = vpop.f32.mrf.mxu3  ;;  %v2067_v26 = vor.u32 %v2365_v58, %v2064_v59  ;;  %v2102_v58 = vld [vmem:[%s3518_s0 + $0x1e8] sm:$0xf]  ;;  %v2376_v59 = vld [vmem:[%s3518_s0 + $0x1f4] sm:$0xf0] }
  0xde   :  { %v502_v30 = vpop.f32.mrf.mxu2  ;;  %v419_v0 = vpop.f32.mrf.mxu0 }
  0xdf   :  { %v503_v33 = vadd.f32 %v502_v30, %v460_v62  ;;  %v462_v3 = vpop.f32.mrf.mxu1  ;;  %v2366_v62 = vld [vmem:[%s3518_s0 + $0x1ac] sm:$0xf] }
  0xe0   :  { %v463_v36 = vadd.f32 %v462_v3, %v419_v0  ;;  %v2375_v0 = vld [vmem:[%s3518_s0 + $0x1ec] sm:$0xf0] }
  0xe1   :  { %v3017_v13 = vadd.f32 %v545_v44, %v503_v33  ;;  %813 = vmatmul.bf16.gmra.mxu0 %v2018_v34  ;;  %v692_v44 = vpack.c.b16 %v664_v5, %v664_v5  ;;  %v2094_v33 = vld [vmem:[%s3518_s0 + $0x1e0] sm:$0xf] }
  0xe2   :  { %856 = vmatmul.bf16.gmra.mxu1 %v2022_v31  ;;  %v555_v2 = vpop.f32.mrf.mxu3  ;;  %v2095_v38 = vor.u32 %v2375_v0, %v2094_v33  ;;  %v2126_v33 = vld [vmem:[%s3518_s0 + $0x220] sm:$0xf]  ;;  %v2383_v0 = vld [vmem:[%s3518_s0 + $0x22c] sm:$0xf0] }
  0xe3   :  { %2032 = vmatmul.msk.bf16.gmra.mxu2 %vm368_vm0, %v2026_v35 }
  0xe6   :  { %v505_v39 = vpop.f32.mrf.mxu2  ;;  %v421_v16 = vpop.f32.mrf.mxu0 }
  0xe7   :  { %v506_v40 = vadd.f32 %v505_v39, %v463_v36  ;;  %v464_v41 = vpop.f32.mrf.mxu1  ;;  %1092 = vmatmul.bf16.vlgmr.msra.gmra.mxu3 %v2063_v6 }
  0xe8   :  { %v465_v42 = vadd.f32 %v464_v41, %v421_v16  ;;  %v2080_v16 = vld [vmem:[%s3518_s0 + $0x1d0] sm:$0xf0]  ;;  %v2086_v41 = vld [vmem:[%s3518_s0 + $0x1c8] sm:$0xf] }
  0xe9   :  { %v3029_v4 = vadd.f32 %v548_v20, %v506_v40  ;;  %v2369_v40 = vld [vmem:[%s3518_s0 + $0x1c4] sm:$0xf]  ;;  %v2087_v24 = vor.u32 %v2372_v19, %v2086_v41 }
  0xea   :  { %v558_v49 = vpop.f32.mrf.mxu3  ;;  %v2083_v5 = vor.u32 %v2369_v40, %v2080_v16  ;;  %v2127_v40 = vor.u32 %v2383_v0, %v2126_v33  ;;  %v2377_v19 = vld [vmem:[%s3518_s0 + $0x204] sm:$0xf] }
  0xee   :  { %v507_v43 = vpop.f32.mrf.mxu2  ;;  %v424_v10 = vpop.f32.mrf.mxu0 }
  0xef   :  { %v508_v47 = vadd.f32 %v507_v43, %v465_v42  ;;  %v467_v11 = vpop.f32.mrf.mxu1  ;;  %v2370_v42 = vld [vmem:[%s3518_s0 + $0x1cc] sm:$0xf] }
  0xf0   :  { %v468_v48 = vadd.f32 %v467_v11, %v424_v10  ;;  %v2110_v11 = vld [vmem:[%s3518_s0 + $0x200] sm:$0xf] }
  0xf1   :  { %v3031_v50 = vadd.f32 %v550_v63, %v508_v47  ;;  %818 = vmatmul.bf16.gmra.mxu0 %v692_v44  ;;  %v2072_v63 = vld [vmem:[%s3518_s0 + $0x1b8] sm:$0xf0] }
  0xf2   :  { %861 = vmatmul.bf16.gmra.mxu1 %v693_v45  ;;  %v560_v20 = vpop.f32.mrf.mxu3  ;;  %v2075_v27 = vor.u32 %v2366_v62, %v2072_v63 }
  0xf3   :  { %2033 = vmatmul.msk.bf16.gmra.mxu2 %vm368_vm0, %v694_v14  ;;  %v2379_v14 = vld [vmem:[%s3518_s0 + $0x20c] sm:$0xf0]  ;;  %v2373_v20 = vld [vmem:[%s3518_s0 + $0x1e4] sm:$0xf] }
  0xf6   :  { %v510_v52 = vpop.f32.mrf.mxu2  ;;  %v426_v18 = vpop.f32.mrf.mxu0 }
  0xf7   :  { %v511_v53 = vadd.f32 %v510_v52, %v468_v48  ;;  %v469_v54 = vpop.f32.mrf.mxu1  ;;  %1097 = vmatmul.bf16.gmra.mxu3 %v2079_v56  ;;  %v2096_v56 = vld [vmem:[%s3518_s0 + $0x1f0] sm:$0xf0] }
  0xf8   :  { %v470_v55 = vadd.f32 %v469_v54, %v426_v18  ;;  %v2111_v18 = vor.u32 %v2379_v14, %v2110_v11  ;;  %v2099_v63 = vor.u32 %v2373_v20, %v2096_v56 }
  0xf9   :  { %v3040_v57 = vadd.f32 %v553_v9, %v511_v53 }
  0xfa   :  { %v746_v34 = vpop.f32.mrf.mxu3 }
  0xfe   :  { %v512_v25 = vpop.f32.mrf.mxu2  ;;  %v429_v29 = vpop.f32.mrf.mxu0 }
  0xff   :  { %v513_v22 = vadd.f32 %v512_v25, %v470_v55  ;;  %v472_v23 = vpop.f32.mrf.mxu1  ;;  %v2103_v25 = vor.u32 %v2376_v59, %v2102_v58 }
 0x100   :  { %v473_v30 = vadd.f32 %v472_v23, %v429_v29  ;;  %v2107_v29 = vor.u32 %v2374_v60, %v2104_v61 }
 0x101   :  { %v3060_v31 = vadd.f32 %v555_v2, %v513_v22  ;;  %1135 = vmatmul.bf16.vlgmr.msra.gmra.mxu0 %v2067_v26  ;;  %v2088_v2 = vld [vmem:[%s3518_s0 + $0x1d8] sm:$0xf0] }
 0x102   :  { %1178 = vmatmul.bf16.vlgmr.msra.gmra.mxu1 %v2071_v12  ;;  %v748_v37 = vpop.f32.mrf.mxu3  ;;  %v2091_v44 = vor.u32 %v2370_v42, %v2088_v2  ;;  %v2112_v42 = vld [vmem:[%s3518_s0 + $0x210] sm:$0xf0]  ;;  %v2118_v2 = vld [vmem:[%s3518_s0 + $0x208] sm:$0xf] }
 0x103   :  { %2156 = vmatmul.msk.bf16.vlgmr.msra.gmra.mxu2 %vm368_vm0, %v2075_v27 }
 0x106   :  { %v515_v3 = vpop.f32.mrf.mxu2  ;;  %v431_v36 = vpop.f32.mrf.mxu0 }
 0x107   :  { %v516_v35 = vadd.f32 %v515_v3, %v473_v30  ;;  %v474_v9 = vpop.f32.mrf.mxu1  ;;  %1102 = vmatmul.bf16.gmra.mxu3 %v2095_v38 }
 0x109   :  { %v3069_v39 = vadd.f32 %v558_v49, %v516_v35 }
 0x10a   :  { %v751_v47 = vpop.f32.mrf.mxu3 }
 0x10e   :  { %v517_v6 = vpop.f32.mrf.mxu2  ;;  %v789_v28 = vpop.f32.mrf.mxu0 }
 0x10f   :  { %v832_v43 = vpop.f32.mrf.mxu1  ;;  %v790_v45 = vadd.f32 %v789_v28, %v746_v34  ;;  %v2380_v6 = vld [vmem:[%s3518_s0 + $0x214] sm:$0xf0] }
 0x111   :  { %v833_v10 = vadd.f32 %v832_v43, %v790_v45  ;;  %1140 = vmatmul.bf16.gmra.mxu0 %v2083_v5  ;;  %v2378_v5 = vld [vmem:[%s3518_s0 + $0x20c] sm:$0xf]  ;;  %v2115_v43 = vor.u32 %v2377_v19, %v2112_v42 }
 0x112   :  { %1183 = vmatmul.bf16.gmra.mxu1 %v2087_v24  ;;  %v753_v53 = vpop.f32.mrf.mxu3  ;;  %v2120_v24 = vld [vmem:[%s3518_s0 + $0x218] sm:$0xf0] }
 0x113   :  { %2157 = vmatmul.msk.bf16.gmra.mxu2 %vm368_vm0, %v2091_v44  ;;  %v2119_v44 = vor.u32 %v2380_v6, %v2118_v2  ;;  %v2123_v11 = vor.u32 %v2378_v5, %v2120_v24 }
 0x116   :  { %v875_v48 = vpop.f32.mrf.mxu2  ;;  %v791_v15 = vpop.f32.mrf.mxu0 }
 0x117   :  { %v3096_v49 = vadd.f32 %v875_v48, %v833_v10  ;;  %v834_v51 = vpop.f32.mrf.mxu1  ;;  %v792_v52 = vadd.f32 %v791_v15, %v748_v37  ;;  %1107 = vmatmul.bf16.gmra.mxu3 %v2111_v18 }
 0x119   :  { %v1603_v54 = vmax.f32 %v2909_v17, %v3096_v49  ;;  %v835_v55 = vadd.f32 %v834_v51, %v792_v52  ;;  %v2142_v52 = vld [vmem:[%s3518_s0 + $0x240] sm:$0xf] }
 0x11a   :  { %v756_v27 = vpop.f32.mrf.mxu3 }
 0x11e   :  { %v877_v62 = vpop.f32.mrf.mxu2  ;;  %v794_v12 = vpop.f32.mrf.mxu0 }
 0x11f   :  { %v3118_v26 = vadd.f32 %v877_v62, %v835_v55  ;;  %v837_v22 = vpop.f32.mrf.mxu1  ;;  %v795_v23 = vadd.f32 %v794_v12, %v751_v47  ;;  %v2134_v12 = vld [vmem:[%s3518_s0 + $0x228] sm:$0xf] }
 0x121   :  { %v1604_v30 = vmax.f32 %v2933_v8, %v3118_v26  ;;  %v838_v34 = vadd.f32 %v837_v22, %v795_v23  ;;  %1145 = vmatmul.bf16.gmra.mxu0 %v2099_v63  ;;  %v2381_v63 = vld [vmem:[%s3518_s0 + $0x224] sm:$0xf]  ;;  %v2384_v22 = vld [vmem:[%s3518_s0 + $0x234] sm:$0xf0]  ;;  %v2136_v23 = vld [vmem:[%s3518_s0 + $0x238] sm:$0xf0] }
 0x122   :  { %1188 = vmatmul.bf16.gmra.mxu1 %v2103_v25  ;;  %v758_v38 = vpop.f32.mrf.mxu3  ;;  %v2128_v25 = vld [vmem:[%s3518_s0 + $0x230] sm:$0xf0]  ;;  %v2135_v33 = vor.u32 %v2384_v22, %v2134_v12 }
 0x123   :  { %2158 = vmatmul.msk.bf16.gmra.mxu2 %vm368_vm0, %v2107_v29  ;;  %v2382_v29 = vld [vmem:[%s3518_s0 + $0x22c] sm:$0xf] }
 0x126   :  { %v880_v3 = vpop.f32.mrf.mxu2  ;;  %v796_v36 = vpop.f32.mrf.mxu0 }
 0x127   :  { %v3129_v35 = vadd.f32 %v880_v3, %v838_v34  ;;  %v839_v9 = vpop.f32.mrf.mxu1  ;;  %v797_v37 = vadd.f32 %v796_v36, %v753_v53  ;;  %1112 = vmatmul.bf16.gmra.mxu3 %v2127_v40  ;;  %v2387_v53 = vld [vmem:[%s3518_s0 + $0x24c] sm:$0xf0]  ;;  %v2131_v34 = vor.u32 %v2381_v63, %v2128_v25 }
 0x128   :  { %v2143_v60 = vor.u32 %v2387_v53, %v2142_v52  ;;  %v2386_v52 = vld [vmem:[%s3518_s0 + $0x24c] sm:$0xf]  ;;  %v2152_v53 = vld [vmem:[%s3518_s0 + $0x258] sm:$0xf0] }
 0x129   :  { %v1605_v16 = vmax.f32 %v2942_v32, %v3129_v35  ;;  %v840_v41 = vadd.f32 %v839_v9, %v797_v37  ;;  %v2139_v9 = vor.u32 %v2382_v29, %v2136_v23  ;;  %v2191_v29 = vld [vmem:[%s3518_s0 + $0x270] sm:$0xf]  ;;  %v2391_v23 = vld [vmem:[%s3518_s0 + $0x27c] sm:$0xf0] }
 0x12a   :  { %v761_v48 = vpop.f32.mrf.mxu3 }
 0x12e   :  { %v882_v28 = vpop.f32.mrf.mxu2  ;;  %v799_v47 = vpop.f32.mrf.mxu0 }
 0x12f   :  { %v3151_v45 = vadd.f32 %v882_v28, %v840_v41  ;;  %v842_v10 = vpop.f32.mrf.mxu1  ;;  %v800_v14 = vadd.f32 %v799_v47, %v756_v27  ;;  %v2058_v41 = vld [vmem:[%s3518_s0 + $0x260] sm:$0x11] }
 0x130   :  { %v1010_v42 = vunpack.c.l.b16 %v2058_v41 }
 0x131   :  { %v1606_v15 = vmax.f32 %v2962_v1, %v3151_v45  ;;  %v843_v51 = vadd.f32 %v842_v10, %v800_v14  ;;  %1150 = vmatmul.bf16.gmra.mxu0 %v2115_v43  ;;  %v2144_v14 = vld [vmem:[%s3518_s0 + $0x250] sm:$0xf0] }
 0x132   :  { %1193 = vmatmul.bf16.gmra.mxu1 %v2119_v44  ;;  %v763_v59 = vpop.f32.mrf.mxu3  ;;  %v1038_v44 = vpack.c.b16 %v1010_v42, %v1010_v42 }
 0x133   :  { %2159 = vmatmul.msk.bf16.gmra.mxu2 %vm368_vm0, %v2123_v11  ;;  %v2385_v11 = vld [vmem:[%s3518_s0 + $0x244] sm:$0xf] }
 0x136   :  { %v885_v18 = vpop.f32.mrf.mxu2  ;;  %v801_v20 = vpop.f32.mrf.mxu0 }
 0x137   :  { %v3162_v55 = vadd.f32 %v885_v18, %v843_v51  ;;  %v844_v56 = vpop.f32.mrf.mxu1  ;;  %v802_v58 = vadd.f32 %v801_v20, %v758_v38  ;;  %1117 = vmatmul.bf16.gmra.mxu3 %v2143_v60  ;;  %v2388_v51 = vld [vmem:[%s3518_s0 + $0x254] sm:$0xf0]  ;;  %v2147_v20 = vor.u32 %v2385_v11, %v2144_v14 }
 0x139   :  { %v845_v62 = vadd.f32 %v844_v56, %v802_v58  ;;  %v3521_v1 = vmax.f32 %v2971_v46, %v3162_v55 }
 0x13a   :  { %v766_v38 = vpop.f32.mrf.mxu3 }
 0x13e   :  { %v887_v27 = vpop.f32.mrf.mxu2  ;;  %v804_v3 = vpop.f32.mrf.mxu0 }
 0x13f   :  { %v3184_v0 = vadd.f32 %v887_v27, %v845_v62  ;;  %v847_v36 = vpop.f32.mrf.mxu1  ;;  %v805_v37 = vadd.f32 %v804_v3, %v761_v48  ;;  %v2150_v48 = vld [vmem:[%s3518_s0 + $0x248] sm:$0xf]  ;;  %v2155_v62 = vor.u32 %v2386_v52, %v2152_v53 }
 0x140   :  { %v2151_v56 = vor.u32 %v2388_v51, %v2150_v48 }
 0x141   :  { %v848_v19 = vadd.f32 %v847_v36, %v805_v37  ;;  %1155 = vmatmul.bf16.gmra.mxu0 %v2131_v34  ;;  %v2059_v36 = vld [vmem:[%s3518_s0 + $0x268] sm:$0x11] }
 0x142   :  { %1198 = vmatmul.bf16.gmra.mxu1 %v2135_v33  ;;  %v768_v43 = vpop.f32.mrf.mxu3 }
 0x143   :  { %2160 = vmatmul.msk.bf16.gmra.mxu2 %vm368_vm0, %v2139_v9 }
 0x146   :  { %v890_v2 = vpop.f32.mrf.mxu2  ;;  %v806_v5 = vpop.f32.mrf.mxu0 }
 0x147   :  { %v3192_v6 = vadd.f32 %v890_v2, %v848_v19  ;;  %v849_v24 = vpop.f32.mrf.mxu1  ;;  %v807_v28 = vadd.f32 %v806_v5, %v763_v59  ;;  %1122 = vmatmul.bf16.gmra.mxu3 %v1038_v44  ;;  %v1011_v2 = vunpack.c.h.b16 %v2058_v41  ;;  %v1012_v5 = vunpack.c.l.b16 %v2059_v36  ;;  %v2207_v41 = vld [vmem:[%s3518_s0 + $0x290] sm:$0xf] }
 0x149   :  { %v850_v10 = vadd.f32 %v849_v24, %v807_v28  ;;  %v1013_v24 = vunpack.c.h.b16 %v2059_v36  ;;  %v1039_v44 = vpack.c.b16 %v1011_v2, %v1011_v2  ;;  %v2392_v36 = vld [vmem:[%s3518_s0 + $0x284] sm:$0xf0] }
 0x14a   :  { %v771_v25 = vpop.f32.mrf.mxu3 }
 0x14b   :  { %v1041_v51 = vpack.c.b16 %v1013_v24, %v1013_v24 }
 0x14e   :  { %v892_v18 = vpop.f32.mrf.mxu2  ;;  %v809_v59 = vpop.f32.mrf.mxu0 }
 0x14f   :  { %v3214_v58 = vadd.f32 %v892_v18, %v850_v10  ;;  %v852_v60 = vpop.f32.mrf.mxu1  ;;  %v810_v63 = vadd.f32 %v809_v59, %v766_v38  ;;  %v2192_v38 = vor.u32 %v2391_v23, %v2191_v29  ;;  %v1040_v10 = vpack.c.b16 %v1012_v5, %v1012_v5 }
 0x151   :  { %v853_v22 = vadd.f32 %v852_v60, %v810_v63  ;;  %1160 = vmatmul.bf16.gmra.mxu0 %v2147_v20  ;;  %v2395_v20 = vld [vmem:[%s3518_s0 + $0x29c] sm:$0xf0] }
 0x152   :  { %1203 = vmatmul.bf16.gmra.mxu1 %v2151_v56  ;;  %v773_v37 = vpop.f32.mrf.mxu3 }
 0x153   :  { %2161 = vmatmul.msk.bf16.gmra.mxu2 %vm368_vm0, %v2155_v62 }
 0x156   :  { %v895_v27 = vpop.f32.mrf.mxu2  ;;  %v811_v33 = vpop.f32.mrf.mxu0 }
 0x157   :  { %v3225_v34 = vadd.f32 %v895_v27, %v853_v22  ;;  %v854_v3 = vpop.f32.mrf.mxu1  ;;  %v812_v9 = vadd.f32 %v811_v33, %v768_v43  ;;  %1439 = vmatmul.bf16.vlgmr.msrb.gmra.mxu3 %v2192_v38  ;;  %v2208_v22 = vor.u32 %v2395_v20, %v2207_v41  ;;  %v2389_v27 = vld [vmem:[%s3518_s0 + $0x274] sm:$0xf]  ;;  %v2193_v33 = vld [vmem:[%s3518_s0 + $0x280] sm:$0xf0] }
 0x159   :  { %v855_v42 = vadd.f32 %v854_v3, %v812_v9  ;;  %v2199_v3 = vld [vmem:[%s3518_s0 + $0x278] sm:$0xf]  ;;  %v2390_v9 = vld [vmem:[%s3518_s0 + $0x27c] sm:$0xf] }
 0x15a   :  { %v776_v43 = vpop.f32.mrf.mxu3  ;;  %v2200_v2 = vor.u32 %v2392_v36, %v2199_v3  ;;  %v2217_v3 = vld [vmem:[%s3518_s0 + $0x2a8] sm:$0xf0] }
 0x15e   :  { %v897_v28 = vpop.f32.mrf.mxu2  ;;  %v814_v14 = vpop.f32.mrf.mxu0 }
 0x15f   :  { %v3232_v11 = vadd.f32 %v897_v28, %v855_v42  ;;  %v857_v48 = vpop.f32.mrf.mxu1  ;;  %v815_v52 = vadd.f32 %v814_v14, %v771_v25  ;;  %v2196_v42 = vor.u32 %v2389_v27, %v2193_v33  ;;  %v2396_v27 = vld [vmem:[%s3518_s0 + $0x2a4] sm:$0xf0]  ;;  %v2394_v33 = vld [vmem:[%s3518_s0 + $0x29c] sm:$0xf] }
 0x161   :  { %v858_v18 = vadd.f32 %v857_v48, %v815_v52  ;;  %1165 = vmatmul.bf16.gmra.mxu0 %v1039_v44  ;;  %v2223_v52 = vld [vmem:[%s3518_s0 + $0x2b0] sm:$0xf] }
 0x162   :  { %1208 = vmatmul.bf16.gmra.mxu1 %v1040_v10  ;;  %v778_v25 = vpop.f32.mrf.mxu3 }
 0x163   :  { %2162 = vmatmul.msk.bf16.gmra.mxu2 %vm368_vm0, %v1041_v51  ;;  %v2393_v25 = vld [vmem:[%s3518_s0 + $0x294] sm:$0xf] }
 0x166   :  { %v900_v56 = vpop.f32.mrf.mxu2  ;;  %v816_v60 = vpop.f32.mrf.mxu0 }
 0x167   :  { %v3243_v59 = vadd.f32 %v900_v56, %v858_v18  ;;  %v859_v62 = vpop.f32.mrf.mxu1  ;;  %v817_v63 = vadd.f32 %v816_v60, %v773_v37  ;;  %v2201_v37 = vld [vmem:[%s3518_s0 + $0x288] sm:$0xf0]  ;;  %1444 = vmatmul.bf16.gmra.mxu3 %v2208_v22  ;;  %v2399_v18 = vld [vmem:[%s3518_s0 + $0x2bc] sm:$0xf0]  ;;  %v2209_v22 = vld [vmem:[%s3518_s0 + $0x2a0] sm:$0xf0] }
 0x168   :  { %v2204_v44 = vor.u32 %v2390_v9, %v2201_v37  ;;  %v2212_v9 = vor.u32 %v2393_v25, %v2209_v22  ;;  %v2397_v22 = vld [vmem:[%s3518_s0 + $0x2b4] sm:$0xf] }
 0x169   :  { %v860_v23 = vadd.f32 %v859_v62, %v817_v63  ;;  %v2224_v62 = vor.u32 %v2399_v18, %v2223_v52 }
 0x16a   :  { %v1093_v14 = vpop.f32.mrf.mxu3 }
 0x16e   :  { %v902_v38 = vpop.f32.mrf.mxu2  ;;  %v819_v24 = vpop.f32.mrf.mxu0 }
 0x16f   :  { %v3265_v5 = vadd.f32 %v902_v38, %v860_v23  ;;  %v862_v28 = vpop.f32.mrf.mxu1  ;;  %v820_v10 = vadd.f32 %v819_v24, %v776_v43  ;;  %v2215_v23 = vld [vmem:[%s3518_s0 + $0x298] sm:$0xf] }
 0x170   :  { %v2216_v37 = vor.u32 %v2396_v27, %v2215_v23  ;;  %v2225_v23 = vld [vmem:[%s3518_s0 + $0x2c0] sm:$0xf0]  ;;  %v2231_v27 = vld [vmem:[%s3518_s0 + $0x2b8] sm:$0xf] }
 0x171   :  { %v863_v51 = vadd.f32 %v862_v28, %v820_v10  ;;  %1482 = vmatmul.bf16.vlgmr.msrb.gmra.mxu0 %v2196_v42  ;;  %v2239_v10 = vld [vmem:[%s3518_s0 + $0x2d0] sm:$0xf] }
 0x172   :  { %1525 = vmatmul.bf16.vlgmr.msrb.gmra.mxu1 %v2200_v2  ;;  %v1095_v60 = vpop.f32.mrf.mxu3  ;;  %v2220_v2 = vor.u32 %v2394_v33, %v2217_v3  ;;  %v2400_v33 = vld [vmem:[%s3518_s0 + $0x2c4] sm:$0xf0]  ;;  %v2233_v3 = vld [vmem:[%s3518_s0 + $0x2c8] sm:$0xf0] }
 0x173   :  { %2285 = vmatmul.msk.bf16.vlgmr.msrb.gmra.mxu2 %vm368_vm0, %v2204_v44 }
 0x176   :  { %v905_v41 = vpop.f32.mrf.mxu2  ;;  %v821_v43 = vpop.f32.mrf.mxu0 }
 0x177   :  { %v3276_v20 = vadd.f32 %v905_v41, %v863_v51  ;;  %v864_v56 = vpop.f32.mrf.mxu1  ;;  %1449 = vmatmul.bf16.gmra.mxu3 %v2224_v62  ;;  %v2403_v51 = vld [vmem:[%s3518_s0 + $0x2dc] sm:$0xf0] }
 0x178   :  { %v2240_v62 = vor.u32 %v2403_v51, %v2239_v10 }
 0x17a   :  { %v1098_v28 = vpop.f32.mrf.mxu3 }
 0x17e   :  { %v907_v36 = vpop.f32.mrf.mxu2  ;;  %v1136_v38 = vpop.f32.mrf.mxu0 }
 0x17f   :  { %v1179_v42 = vpop.f32.mrf.mxu1  ;;  %v1137_v24 = vadd.f32 %v1136_v38, %v1093_v14 }
 0x181   :  { %v1180_v44 = vadd.f32 %v1179_v42, %v1137_v24  ;;  %1487 = vmatmul.bf16.gmra.mxu0 %v2212_v9  ;;  %v2228_v9 = vor.u32 %v2397_v22, %v2225_v23 }
 0x182   :  { %1530 = vmatmul.bf16.gmra.mxu1 %v2216_v37  ;;  %v1100_v56 = vpop.f32.mrf.mxu3  ;;  %v2232_v37 = vor.u32 %v2400_v33, %v2231_v27  ;;  %v2401_v33 = vld [vmem:[%s3518_s0 + $0x2d4] sm:$0xf] }
 0x183   :  { %2286 = vmatmul.msk.bf16.gmra.mxu2 %vm368_vm0, %v2220_v2 }
 0x186   :  { %v1222_v52 = vpop.f32.mrf.mxu2  ;;  %v1138_v41 = vpop.f32.mrf.mxu0 }
 0x187   :  { %v3305_v18 = vadd.f32 %v1222_v52, %v1180_v44  ;;  %v1181_v43 = vpop.f32.mrf.mxu1  ;;  %v1139_v14 = vadd.f32 %v1138_v41, %v1095_v60  ;;  %v2398_v60 = vld [vmem:[%s3518_s0 + $0x2bc] sm:$0xf]  ;;  %1454 = vmatmul.bf16.gmra.mxu3 %v2240_v62  ;;  %v2255_v52 = vld [vmem:[%s3518_s0 + $0x2f0] sm:$0xf]  ;;  %v2407_v41 = vld [vmem:[%s3518_s0 + $0x2fc] sm:$0xf0] }
 0x188   :  { %v2236_v24 = vor.u32 %v2398_v60, %v2233_v3  ;;  %v2256_v23 = vor.u32 %v2407_v41, %v2255_v52  ;;  %v2241_v60 = vld [vmem:[%s3518_s0 + $0x2e0] sm:$0xf0]  ;;  %v2247_v3 = vld [vmem:[%s3518_s0 + $0x2d8] sm:$0xf] }
 0x189   :  { %v1182_v25 = vadd.f32 %v1181_v43, %v1139_v14 }
 0x18a   :  { %v1103_v10 = vpop.f32.mrf.mxu3 }
 0x18e   :  { %v1224_v36 = vpop.f32.mrf.mxu2  ;;  %v1141_v42 = vpop.f32.mrf.mxu0 }
 0x18f   :  { %v3325_v38 = vadd.f32 %v1224_v36, %v1182_v25  ;;  %v1184_v2 = vpop.f32.mrf.mxu1  ;;  %v1142_v44 = vadd.f32 %v1141_v42, %v1098_v28  ;;  %v2404_v36 = vld [vmem:[%s3518_s0 + $0x2e4] sm:$0xf0]  ;;  %v2244_v42 = vor.u32 %v2401_v33, %v2241_v60 }
 0x191   :  { %v1185_v51 = vadd.f32 %v1184_v2, %v1142_v44  ;;  %1492 = vmatmul.bf16.gmra.mxu0 %v2228_v9  ;;  %v2249_v9 = vld [vmem:[%s3518_s0 + $0x2e8] sm:$0xf0]  ;;  %v2248_v2 = vor.u32 %v2404_v36, %v2247_v3 }
 0x192   :  { %1535 = vmatmul.bf16.gmra.mxu1 %v2232_v37  ;;  %v1105_v22 = vpop.f32.mrf.mxu3 }
 0x193   :  { %2287 = vmatmul.msk.bf16.gmra.mxu2 %vm368_vm0, %v2236_v24 }
 0x196   :  { %v1227_v43 = vpop.f32.mrf.mxu2  ;;  %v1143_v62 = vpop.f32.mrf.mxu0 }
 0x197   :  { %v3334_v14 = vadd.f32 %v1227_v43, %v1185_v51  ;;  %v1186_v25 = vpop.f32.mrf.mxu1  ;;  %v1144_v28 = vadd.f32 %v1143_v62, %v1100_v56  ;;  %v2402_v56 = vld [vmem:[%s3518_s0 + $0x2dc] sm:$0xf]  ;;  %1459 = vmatmul.bf16.gmra.mxu3 %v2256_v23 }
 0x198   :  { %v2252_v52 = vor.u32 %v2402_v56, %v2249_v9  ;;  %v2405_v9 = vld [vmem:[%s3518_s0 + $0x2f4] sm:$0xf] }
 0x199   :  { %v1187_v27 = vadd.f32 %v1186_v25, %v1144_v28  ;;  %v2271_v25 = vld [vmem:[%s3518_s0 + $0x310] sm:$0xf]  ;;  %v2411_v28 = vld [vmem:[%s3518_s0 + $0x31c] sm:$0xf0] }
 0x19a   :  { %v1108_v43 = vpop.f32.mrf.mxu3  ;;  %v2272_v36 = vor.u32 %v2411_v28, %v2271_v25 }
 0x19e   :  { %v1229_v37 = vpop.f32.mrf.mxu2  ;;  %v1146_v44 = vpop.f32.mrf.mxu0 }
 0x19f   :  { %v3354_v24 = vadd.f32 %v1229_v37, %v1187_v27  ;;  %v1189_v51 = vpop.f32.mrf.mxu1  ;;  %v1147_v41 = vadd.f32 %v1146_v44, %v1103_v10  ;;  %v2257_v37 = vld [vmem:[%s3518_s0 + $0x300] sm:$0xf0]  ;;  %v2265_v44 = vld [vmem:[%s3518_s0 + $0x308] sm:$0xf0] }
 0x1a1   :  { %v1190_v62 = vadd.f32 %v1189_v51, %v1147_v41  ;;  %1497 = vmatmul.bf16.gmra.mxu0 %v2244_v42  ;;  %v2263_v42 = vld [vmem:[%s3518_s0 + $0x2f8] sm:$0xf] }
 0x1a2   :  { %1540 = vmatmul.bf16.gmra.mxu1 %v2248_v2  ;;  %v1110_v3 = vpop.f32.mrf.mxu3  ;;  %v2408_v2 = vld [vmem:[%s3518_s0 + $0x304] sm:$0xf0] }
 0x1a3   :  { %2288 = vmatmul.msk.bf16.gmra.mxu2 %vm368_vm0, %v2252_v52  ;;  %v2260_v52 = vor.u32 %v2405_v9, %v2257_v37  ;;  %v2264_v41 = vor.u32 %v2408_v2, %v2263_v42 }
 0x1a6   :  { %v1232_v23 = vpop.f32.mrf.mxu2  ;;  %v1148_v33 = vpop.f32.mrf.mxu0 }
 0x1a7   :  { %v3363_v27 = vadd.f32 %v1232_v23, %v1190_v62  ;;  %v1191_v60 = vpop.f32.mrf.mxu1  ;;  %v1149_v10 = vadd.f32 %v1148_v33, %v1105_v22  ;;  %v2406_v22 = vld [vmem:[%s3518_s0 + $0x2fc] sm:$0xf]  ;;  %1464 = vmatmul.bf16.gmra.mxu3 %v2272_v36 }
 0x1a8   :  { %v2268_v23 = vor.u32 %v2406_v22, %v2265_v44  ;;  %v2409_v44 = vld [vmem:[%s3518_s0 + $0x314] sm:$0xf] }
 0x1a9   :  { %v1192_v56 = vadd.f32 %v1191_v60, %v1149_v10  ;;  %v2187_v10 = vld [vmem:[%s3518_s0 + $0x330] sm:$0x11] }
 0x1aa   :  { %v1113_v60 = vpop.f32.mrf.mxu3  ;;  %v1357_v36 = vunpack.c.l.b16 %v2187_v10 }
 0x1ac   :  { %v1385_v22 = vpack.c.b16 %v1357_v36, %v1357_v36 }
 0x1ae   :  { %v1234_v51 = vpop.f32.mrf.mxu2  ;;  %v1151_v25 = vpop.f32.mrf.mxu0 }
 0x1af   :  { %v3383_v62 = vadd.f32 %v1234_v51, %v1192_v56  ;;  %v1194_v28 = vpop.f32.mrf.mxu1  ;;  %v1152_v33 = vadd.f32 %v1151_v25, %v1108_v43  ;;  %v2273_v51 = vld [vmem:[%s3518_s0 + $0x320] sm:$0xf0] }
 0x1b0   :  { %v2276_v25 = vor.u32 %v2409_v44, %v2273_v51 }
 0x1b1   :  { %v1195_v63 = vadd.f32 %v1194_v28, %v1152_v33  ;;  %1502 = vmatmul.bf16.gmra.mxu0 %v2260_v52  ;;  %v2279_v52 = vld [vmem:[%s3518_s0 + $0x318] sm:$0xf] }
 0x1b2   :  { %1545 = vmatmul.bf16.gmra.mxu1 %v2264_v41  ;;  %v1115_v2 = vpop.f32.mrf.mxu3 }
 0x1b3   :  { %2289 = vmatmul.msk.bf16.gmra.mxu2 %vm368_vm0, %v2268_v23 }
 0x1b6   :  { %v1237_v48 = vpop.f32.mrf.mxu2  ;;  %v1153_v56 = vpop.f32.mrf.mxu0 }
 0x1b7   :  { %v3389_v9 = vadd.f32 %v1237_v48, %v1195_v63  ;;  %v1196_v37 = vpop.f32.mrf.mxu1  ;;  %v1154_v42 = vadd.f32 %v1153_v56, %v1110_v3  ;;  %v2412_v48 = vld [vmem:[%s3518_s0 + $0x324] sm:$0xf0]  ;;  %v2410_v63 = vld [vmem:[%s3518_s0 + $0x31c] sm:$0xf]  ;;  %v2281_v3 = vld [vmem:[%s3518_s0 + $0x328] sm:$0xf0]  ;;  %1469 = vmatmul.bf16.gmra.mxu3 %v1385_v22 }
 0x1b8   :  { %v2280_v28 = vor.u32 %v2412_v48, %v2279_v52  ;;  %v2284_v56 = vor.u32 %v2410_v63, %v2281_v3  ;;  %v1358_v48 = vunpack.c.h.b16 %v2187_v10 }
 0x1b9   :  { %v1197_v43 = vadd.f32 %v1196_v37, %v1154_v42 }
 0x1ba   :  { %v1118_v42 = vpop.f32.mrf.mxu3 }
 0x1be   :  { %v1239_v41 = vpop.f32.mrf.mxu2  ;;  %v1156_v33 = vpop.f32.mrf.mxu0 }
 0x1bf   :  { %v3409_v23 = vadd.f32 %v1239_v41, %v1197_v43  ;;  %v1199_v36 = vpop.f32.mrf.mxu1  ;;  %v1157_v37 = vadd.f32 %v1156_v33, %v1113_v60  ;;  %v2188_v43 = vld [vmem:[%s3518_s0 + $0x338] sm:$0x11]  ;;  %v1386_v41 = vpack.c.b16 %v1358_v48, %v1358_v48 }
 0x1c0   :  { %v1359_v60 = vunpack.c.l.b16 %v2188_v43  ;;  %v1360_v63 = vunpack.c.h.b16 %v2188_v43 }
 0x1c1   :  { %v1200_v29 = vadd.f32 %v1199_v36, %v1157_v37  ;;  %1507 = vmatmul.bf16.gmra.mxu0 %v2276_v25 }
 0x1c2   :  { %1550 = vmatmul.bf16.gmra.mxu1 %v2280_v28  ;;  %v1120_v51 = vpop.f32.mrf.mxu3  ;;  %v1387_v25 = vpack.c.b16 %v1359_v60, %v1359_v60 }
 0x1c3   :  { %2290 = vmatmul.msk.bf16.gmra.mxu2 %vm368_vm0, %v2284_v56 }
 0x1c6   :  { %v1242_v53 = vpop.f32.mrf.mxu2  ;;  %v1158_v12 = vpop.f32.mrf.mxu0 }
 0x1c7   :  { %v3412_v19 = vadd.f32 %v1242_v53, %v1200_v29  ;;  %v1201_v22 = vpop.f32.mrf.mxu1  ;;  %v1159_v44 = vadd.f32 %v1158_v12, %v1115_v2  ;;  %v1388_v29 = vpack.c.b16 %v1360_v63, %v1360_v63 }
 0x1c9   :  { %v1202_v52 = vadd.f32 %v1201_v22, %v1159_v44 }
 0x1ca   :  { %v1123_v56 = vpop.f32.mrf.mxu3 }
 0x1ce   :  { %v1244_v3 = vpop.f32.mrf.mxu2  ;;  %v1161_v33 = vpop.f32.mrf.mxu0 }
 0x1cf   :  { %v3417_v28 = vadd.f32 %v1244_v3, %v1202_v52  ;;  %v1204_v53 = vpop.f32.mrf.mxu1  ;;  %v1162_v36 = vadd.f32 %v1161_v33, %v1118_v42 }
 0x1d1   :  { %v1205_v37 = vadd.f32 %v1204_v53, %v1162_v36  ;;  %1512 = vmatmul.bf16.gmra.mxu0 %v1386_v41 }
 0x1d2   :  { %1555 = vmatmul.bf16.gmra.mxu1 %v1387_v25  ;;  %v1125_v44 = vpop.f32.mrf.mxu3 }
 0x1d3   :  { %2291 = vmatmul.msk.bf16.gmra.mxu2 %vm368_vm0, %v1388_v29 }
 0x1d6   :  { %v1247_v12 = vpop.f32.mrf.mxu2  ;;  %v1163_v10 = vpop.f32.mrf.mxu0 }
 0x1d7   :  { %v3420_v2 = vadd.f32 %v1247_v12, %v1205_v37  ;;  %v1206_v22 = vpop.f32.mrf.mxu1  ;;  %v1164_v43 = vadd.f32 %v1163_v10, %v1120_v51 }
 0x1d9   :  { %v1207_v48 = vadd.f32 %v1206_v22, %v1164_v43 }
 0x1da   :  { %v1440_v33 = vpop.f32.mrf.mxu3 }
 0x1de   :  { %v1249_v52 = vpop.f32.mrf.mxu2  ;;  %v1166_v3 = vpop.f32.mrf.mxu0 }
 0x1df   :  { %v3422_v60 = vadd.f32 %v1249_v52, %v1207_v48  ;;  %v1209_v63 = vpop.f32.mrf.mxu1  ;;  %v1167_v42 = vadd.f32 %v1166_v3, %v1123_v56 }
 0x1e1   :  { %v1210_v53 = vadd.f32 %v1209_v63, %v1167_v42 }
 0x1e2   :  { %v1442_v37 = vpop.f32.mrf.mxu3 }
 0x1e6   :  { %v1252_v41 = vpop.f32.mrf.mxu2  ;;  %v1168_v29 = vpop.f32.mrf.mxu0 }
 0x1e7   :  { %v3424_v25 = vadd.f32 %v1252_v41, %v1210_v53  ;;  %v1211_v36 = vpop.f32.mrf.mxu1 }
 0x1ea   :  { %v1445_v10 = vpop.f32.mrf.mxu3 }
 0x1ee   :  { %v1254_v12 = vpop.f32.mrf.mxu2  ;;  %v1483_v47 = vpop.f32.mrf.mxu0 }
 0x1ef   :  { %v1526_v40 = vpop.f32.mrf.mxu1  ;;  %v1484_v51 = vadd.f32 %v1483_v47, %v1440_v33  ;;  %v3433_v47 = vld [vmem:[%s3519_s2] ss:$0 sm:$0xff] }
 0x1f1   :  { %v1527_v22 = vadd.f32 %v1526_v40, %v1484_v51 }
 0x1f2   :  { %v1447_v61 = vpop.f32.mrf.mxu3 }
 0x1f6   :  { %v1569_v43 = vpop.f32.mrf.mxu2  ;;  %v1485_v48 = vpop.f32.mrf.mxu0 }
 0x1f7   :  { %v1570_v44 = vadd.f32 %v1569_v43, %v1527_v22  ;;  %v1528_v52 = vpop.f32.mrf.mxu1  ;;  %v1486_v3 = vadd.f32 %v1485_v48, %v1442_v37 }
 0x1f9   :  { %v1616_v56 = vmax.f32 %v3305_v18, %v1570_v44  ;;  %v1529_v42 = vadd.f32 %v1528_v52, %v1486_v3 }
 0x1fa   :  { %v1450_v36 = vpop.f32.mrf.mxu3 }
 0x1fb   :  { %v1629_v63 = vmax.f32 %v1603_v54, %v1616_v56 }
 0x1fd   :  { %v1646_v18 = vadd.f32 %v3433_v47, %v1629_v63 }
 0x1fe   :  { %v1571_v53 = vpop.f32.mrf.mxu2  ;;  %v1488_v33 = vpop.f32.mrf.mxu0 }
 0x1ff   :  { %v1572_v40 = vadd.f32 %v1571_v53, %v1529_v42  ;;  %v1531_v41 = vpop.f32.mrf.mxu1  ;;  %v1489_v29 = vadd.f32 %v1488_v33, %v1445_v10  ;;  %v1659_v51 = vmax.f32 %v1646_v18, 0.0 }
 0x201   :  { %v1617_v12 = vmax.f32 %v3325_v38, %v1572_v40  ;;  %v1532_v49 = vadd.f32 %v1531_v41, %v1489_v29 }
 0x202   :  { %v1452_v52 = vpop.f32.mrf.mxu3 }
 0x203   :  { %v1630_v17 = vmax.f32 %v1604_v30, %v1617_v12 }
 0x205   :  { %v1647_v54 = vadd.f32 %v3433_v47, %v1630_v17 }
 0x206   :  { %v1574_v37 = vpop.f32.mrf.mxu2  ;;  %v1490_v44 = vpop.f32.mrf.mxu0 }
 0x207   :  { %v1660_v22 = vmax.f32 %v1647_v54, 0.0  ;;  %v1575_v43 = vadd.f32 %v1574_v37, %v1532_v49  ;;  %v1533_v48 = vpop.f32.mrf.mxu1  ;;  %v1491_v38 = vadd.f32 %v1490_v44, %v1447_v61 }
 0x209   :  { %v2416_v10 = vpack.c.bf16 %v1660_v22, %v1659_v51  ;;  %v1618_v56 = vmax.f32 %v3334_v14, %v1575_v43  ;;  %v1534_v26 = vadd.f32 %v1533_v48, %v1491_v38 }
 0x20a   :  { %v1455_v40 = vpop.f32.mrf.mxu3 }
 0x20b   :  { %2417 = vst [vmem:[%s3520_s3] sm:$0xff] %v2416_v10   ;;  %v1631_v8 = vmax.f32 %v1605_v16, %v1618_v56 }
 0x20d   :  { %v1648_v14 = vadd.f32 %v3433_v47, %v1631_v8 }
 0x20e   :  { %v1576_v30 = vpop.f32.mrf.mxu2  ;;  %v1493_v63 = vpop.f32.mrf.mxu0 }
 0x20f   :  { %v1577_v3 = vadd.f32 %v1576_v30, %v1534_v26  ;;  %v1536_v42 = vpop.f32.mrf.mxu1  ;;  %v1494_v53 = vadd.f32 %v1493_v63, %v1450_v36  ;;  %v1661_v35 = vmax.f32 %v1648_v14, 0.0 }
 0x211   :  { %v1619_v33 = vmax.f32 %v3354_v24, %v1577_v3  ;;  %v1537_v41 = vadd.f32 %v1536_v42, %v1494_v53 }
 0x212   :  { %v1457_v49 = vpop.f32.mrf.mxu3 }
 0x213   :  { %v1632_v61 = vmax.f32 %v1606_v15, %v1619_v33 }
 0x215   :  { %v1649_v29 = vadd.f32 %v3433_v47, %v1632_v61 }
 0x216   :  { %v1579_v32 = vpop.f32.mrf.mxu2  ;;  %v1495_v18 = vpop.f32.mrf.mxu0 }
 0x217   :  { %v1662_v16 = vmax.f32 %v1649_v29, 0.0  ;;  %v1580_v12 = vadd.f32 %v1579_v32, %v1537_v41  ;;  %v1538_v17 = vpop.f32.mrf.mxu1  ;;  %v1496_v24 = vadd.f32 %v1495_v18, %v1452_v52  ;;  %v3522_v52 = vmax.f32 %v2991_v21, %v3184_v0 }
 0x218   :  { %v3523_v21 = vmax.f32 %v2997_v7, %v3192_v6 }
 0x219   :  { %v2421_v36 = vpack.c.bf16 %v1662_v16, %v1661_v35  ;;  %v1620_v54 = vmax.f32 %v3363_v27, %v1580_v12  ;;  %v1539_v15 = vadd.f32 %v1538_v17, %v1496_v24  ;;  %v3524_v12 = vmax.f32 %v3017_v13, %v3214_v58 }
 0x21a   :  { %v1460_v48 = vpop.f32.mrf.mxu3  ;;  %v3525_v13 = vmax.f32 %v3029_v4, %v3225_v34 }
 0x21b   :  { %2443 = vst [vmem:[%s3520_s3 + $0x8] sm:$0xff] %v2421_v36   ;;  %v1633_v45 = vmax.f32 %v3521_v1, %v1620_v54 }
 0x21d   :  { %v1650_v27 = vadd.f32 %v3433_v47, %v1633_v45 }
 0x21e   :  { %v1581_v37 = vpop.f32.mrf.mxu2  ;;  %v1498_v22 = vpop.f32.mrf.mxu0 }
 0x21f   :  { %v1582_v51 = vadd.f32 %v1581_v37, %v1539_v15  ;;  %v1541_v43 = vpop.f32.mrf.mxu1  ;;  %v1499_v44 = vadd.f32 %v1498_v22, %v1455_v40  ;;  %v1663_v55 = vmax.f32 %v1650_v27, 0.0 }
 0x221   :  { %v1621_v10 = vmax.f32 %v3383_v62, %v1582_v51  ;;  %v1542_v38 = vadd.f32 %v1541_v43, %v1499_v44 }
 0x222   :  { %v1462_v42 = vpop.f32.mrf.mxu3 }
 0x223   :  { %v1634_v56 = vmax.f32 %v3522_v52, %v1621_v10 }
 0x225   :  { %v1651_v8 = vadd.f32 %v3433_v47, %v1634_v56  ;;  %v3526_v56 = vmax.f32 %v3031_v50, %v3232_v11  ;;  %v3527_v50 = vmax.f32 %v3040_v57, %v3243_v59 }
 0x226   :  { %v1584_v46 = vpop.f32.mrf.mxu2  ;;  %v1500_v3 = vpop.f32.mrf.mxu0 }
 0x227   :  { %v1664_v26 = vmax.f32 %v1651_v8, 0.0  ;;  %v1585_v30 = vadd.f32 %v1584_v46, %v1542_v38  ;;  %v1543_v63 = vpop.f32.mrf.mxu1  ;;  %v1501_v62 = vadd.f32 %v1500_v3, %v1457_v49 }
 0x229   :  { %v2426_v53 = vpack.c.bf16 %v1664_v26, %v1663_v55  ;;  %v1622_v40 = vmax.f32 %v3389_v9, %v1585_v30  ;;  %v1544_v33 = vadd.f32 %v1543_v63, %v1501_v62 }
 0x22a   :  { %v1465_v35 = vpop.f32.mrf.mxu3 }
 0x22b   :  { %2444 = vst [vmem:[%s3520_s3 + $0x10] sm:$0xff] %v2426_v53   ;;  %v1635_v0 = vmax.f32 %v3523_v21, %v1622_v40 }
 0x22d   :  { %v1652_v9 = vadd.f32 %v3433_v47, %v1635_v0 }
 0x22e   :  { %v1586_v14 = vpop.f32.mrf.mxu2  ;;  %v1503_v41 = vpop.f32.mrf.mxu0 }
 0x22f   :  { %v1587_v61 = vadd.f32 %v1586_v14, %v1544_v33  ;;  %v1546_v29 = vpop.f32.mrf.mxu1  ;;  %v1504_v32 = vadd.f32 %v1503_v41, %v1460_v48  ;;  %v1665_v6 = vmax.f32 %v1652_v9, 0.0 }
 0x231   :  { %v1623_v16 = vmax.f32 %v3409_v23, %v1587_v61  ;;  %v1547_v17 = vadd.f32 %v1546_v29, %v1504_v32 }
 0x232   :  { %v1467_v45 = vpop.f32.mrf.mxu3 }
 0x233   :  { %v1636_v18 = vmax.f32 %v3524_v12, %v1623_v16 }
 0x235   :  { %v1653_v49 = vadd.f32 %v3433_v47, %v1636_v18 }
 0x236   :  { %v1589_v7 = vpop.f32.mrf.mxu2  ;;  %v1505_v24 = vpop.f32.mrf.mxu0 }
 0x237   :  { %v1666_v36 = vmax.f32 %v1653_v49, 0.0  ;;  %v1590_v54 = vadd.f32 %v1589_v7, %v1547_v17  ;;  %v1548_v1 = vpop.f32.mrf.mxu1  ;;  %v1506_v23 = vadd.f32 %v1505_v24, %v1462_v42 }
 0x239   :  { %v2431_v15 = vpack.c.bf16 %v1666_v36, %v1665_v6  ;;  %v1624_v37 = vmax.f32 %v3412_v19, %v1590_v54  ;;  %v1549_v51 = vadd.f32 %v1548_v1, %v1506_v23 }
 0x23a   :  { %v1470_v27 = vpop.f32.mrf.mxu3 }
 0x23b   :  { %2445 = vst [vmem:[%s3520_s3 + $0x18] sm:$0xff] %v2431_v15   ;;  %v1637_v58 = vmax.f32 %v3525_v13, %v1624_v37 }
 0x23d   :  { %v1654_v19 = vadd.f32 %v3433_v47, %v1637_v58 }
 0x23e   :  { %v1591_v22 = vpop.f32.mrf.mxu2  ;;  %v1508_v44 = vpop.f32.mrf.mxu0 }
 0x23f   :  { %v1592_v43 = vadd.f32 %v1591_v22, %v1549_v51  ;;  %v1551_v48 = vpop.f32.mrf.mxu1  ;;  %v1509_v10 = vadd.f32 %v1508_v44, %v1465_v35  ;;  %v1667_v34 = vmax.f32 %v1654_v19, 0.0 }
 0x241   :  { %v1625_v52 = vmax.f32 %v3417_v28, %v1592_v43  ;;  %v1552_v8 = vadd.f32 %v1551_v48, %v1509_v10 }
 0x242   :  { %v1472_v63 = vpop.f32.mrf.mxu3 }
 0x243   :  { %v1638_v38 = vmax.f32 %v3526_v56, %v1625_v52 }
 0x245   :  { %v1655_v46 = vadd.f32 %v3433_v47, %v1638_v38 }
 0x246   :  { %v1594_v4 = vpop.f32.mrf.mxu2  ;;  %v1510_v30 = vpop.f32.mrf.mxu0 }
 0x247   :  { %v1668_v55 = vmax.f32 %v1655_v46, 0.0  ;;  %v1595_v26 = vadd.f32 %v1594_v4, %v1552_v8  ;;  %v1553_v3 = vpop.f32.mrf.mxu1  ;;  %v1511_v28 = vadd.f32 %v1510_v30, %v1467_v45 }
 0x249   :  { %v2436_v42 = vpack.c.bf16 %v1668_v55, %v1667_v34  ;;  %v1626_v53 = vmax.f32 %v3420_v2, %v1595_v26  ;;  %v1554_v40 = vadd.f32 %v1553_v3, %v1511_v28  ;;  %v3528_v2 = vmax.f32 %v3060_v31, %v3265_v5 }
 0x24a   :  { %v3529_v31 = vmax.f32 %v3069_v39, %v3276_v20 }
 0x24b   :  { %2446 = vst [vmem:[%s3520_s3 + $0x20] sm:$0xff] %v2436_v42   ;;  %v1639_v11 = vmax.f32 %v3527_v50, %v1626_v53 }
 0x24d   :  { %v1656_v41 = vadd.f32 %v3433_v47, %v1639_v11 }
 0x24e   :  { %v1596_v62 = vpop.f32.mrf.mxu2  ;;  %v1513_v0 = vpop.f32.mrf.mxu0 }
 0x24f   :  { %v1597_v21 = vadd.f32 %v1596_v62, %v1554_v40  ;;  %v1556_v33 = vpop.f32.mrf.mxu1  ;;  %v1514_v14 = vadd.f32 %v1513_v0, %v1470_v27  ;;  %v1669_v57 = vmax.f32 %v1656_v41, 0.0 }
 0x251   :  { %v1627_v61 = vmax.f32 %v3422_v60, %v1597_v21  ;;  %v1557_v32 = vadd.f32 %v1556_v33, %v1514_v14 }
 0x253   :  { %v1640_v29 = vmax.f32 %v3528_v2, %v1627_v61 }
 0x255   :  { %v1657_v35 = vadd.f32 %v3433_v47, %v1640_v29 }
 0x256   :  { %v1599_v16 = vpop.f32.mrf.mxu2  ;;  %v1515_v12 = vpop.f32.mrf.mxu0 }
 0x257   :  { %v1670_v59 = vmax.f32 %v1657_v35, 0.0  ;;  %v1600_v9 = vadd.f32 %v1599_v16, %v1557_v32  ;;  %v1558_v18 = vpop.f32.mrf.mxu1 }
 0x259   :  { %v2441_v17 = vpack.c.bf16 %v1670_v59, %v1669_v57  ;;  %v1628_v49 = vmax.f32 %v3424_v25, %v1600_v9 }
 0x25b   :  { %2447 = vst [vmem:[%s3520_s3 + $0x28] sm:$0xff] %v2441_v17   ;;  %v1641_v5 = vmax.f32 %v3529_v31, %v1628_v49 }
 0x25d   :  { %v1658_v60 = vadd.f32 %v3433_v47, %v1641_v5 }
 0x25e   :  { %v1601_v7 = vpop.f32.mrf.mxu2 }
 0x25f   :  { %v1671_v6 = vmax.f32 %v1658_v60, 0.0 }
 0x261   :  { %v1684_v36 = vpack.c.bf16 %v1671_v6, %v1671_v6 }
 0x263   :  { %1697 = vst [vmem:[%s3520_s3 + $0x30] sm:$0x1] %v1684_v36 }

// kernel: convnet_forward.5
= control target key start
LH: loop header
LB: loop body
LE: loop exit
PB: predicated region body
PF: predicated region fallthrough
CT: control target
= control target key end

     0   :  { %s1882_s0 = inlined_call_operand.vmem [shape: bf16[2,1568], index: 0, kind: input, shape index: {}]   ;;  %s1883_s1 = inlined_call_operand.vmem [shape: bf16[1568,128], index: 1, kind: input, shape index: {}]   ;;  %s1884_s2 = inlined_call_operand.vmem [shape: f32[1,128], index: 2, kind: input, shape index: {}]   ;;  %s1885_s3 = inlined_call_operand.hbm [shape: f32[2,128], index: 3, kind: output, shape index: {}]  }
   0x1   :  { %v1424_v0 = vld [vmem:[%s1883_s1 + $0x38] sm:$0xff]  ;;  %v1423_v4 = vld [vmem:[%s1883_s1 + $0x30] sm:$0xff]  ;;  %v1422_v8 = vld [vmem:[%s1883_s1 + $0x28] sm:$0xff] }
   0x2   :  { %v1440_v1 = vld [vmem:[%s1883_s1 + $0xb8] sm:$0xff]  ;;  %838 = vmatpush.bf16.msra.mxu0 %v1424_v0  ;;  %v1439_v5 = vld [vmem:[%s1883_s1 + $0xb0] sm:$0xff]  ;;  %v1438_v9 = vld [vmem:[%s1883_s1 + $0xa8] sm:$0xff] }
   0x3   :  { %v1432_v2 = vld [vmem:[%s1883_s1 + $0x78] sm:$0xff]  ;;  %864 = vmatpush.bf16.msra.mxu2 %v1440_v1  ;;  %v1431_v6 = vld [vmem:[%s1883_s1 + $0x70] sm:$0xff]  ;;  %v1430_v10 = vld [vmem:[%s1883_s1 + $0x68] sm:$0xff] }
   0x4   :  { %v1448_v3 = vld [vmem:[%s1883_s1 + $0xf8] sm:$0xff]  ;;  %851 = vmatpush.bf16.msra.mxu1 %v1432_v2  ;;  %v1447_v7 = vld [vmem:[%s1883_s1 + $0xf0] sm:$0xff]  ;;  %v1446_v11 = vld [vmem:[%s1883_s1 + $0xe8] sm:$0xff] }
   0x5   :  { %877 = vmatpush.bf16.msra.mxu3 %v1448_v3  ;;  %v1421_v12 = vld [vmem:[%s1883_s1 + $0x20] sm:$0xff]  ;;  %v1420_v16 = vld [vmem:[%s1883_s1 + $0x18] sm:$0xff]  ;;  %v1419_v21 = vld [vmem:[%s1883_s1 + $0x10] sm:$0xff] }
   0x6   :  { %839 = vmatpush.bf16.msra.mxu0 %v1423_v4  ;;  %v1437_v13 = vld [vmem:[%s1883_s1 + $0xa0] sm:$0xff]  ;;  %v1436_v17 = vld [vmem:[%s1883_s1 + $0x98] sm:$0xff]  ;;  %v1435_v22 = vld [vmem:[%s1883_s1 + $0x90] sm:$0xff] }
   0x7   :  { %865 = vmatpush.bf16.msra.mxu2 %v1439_v5  ;;  %v1429_v14 = vld [vmem:[%s1883_s1 + $0x60] sm:$0xff]  ;;  %v1428_v18 = vld [vmem:[%s1883_s1 + $0x58] sm:$0xff] }
   0x8   :  { %852 = vmatpush.bf16.msra.mxu1 %v1431_v6  ;;  %v1445_v15 = vld [vmem:[%s1883_s1 + $0xe0] sm:$0xff]  ;;  %v1444_v19 = vld [vmem:[%s1883_s1 + $0xd8] sm:$0xff] }
   0x9   :  { %878 = vmatpush.bf16.msra.mxu3 %v1447_v7  ;;  %v16_v20 = vld [vmem:[%s1882_s0] sm:$0xff] }
   0xa   :  { %840 = vmatpush.bf16.msra.mxu0 %v1422_v8  ;;  %219 = vst [vmem:[#allocation1] ss:$9 sm:$0xff] %v16_v20 }
   0xb   :  { %866 = vmatpush.bf16.msra.mxu2 %v1438_v9 }
   0xc   :  { %853 = vmatpush.bf16.msra.mxu1 %v1430_v10 }
   0xd   :  { %879 = vmatpush.bf16.msra.mxu3 %v1446_v11 }
   0xe   :  { %841 = vmatpush.bf16.msra.mxu0 %v1421_v12 }
   0xf   :  { %867 = vmatpush.bf16.msra.mxu2 %v1437_v13 }
  0x10   :  { %854 = vmatpush.bf16.msra.mxu1 %v1429_v14 }
  0x11   :  { %880 = vmatpush.bf16.msra.mxu3 %v1445_v15 }
  0x12   :  { %842 = vmatpush.bf16.msra.mxu0 %v1420_v16 }
  0x13   :  { %868 = vmatpush.bf16.msra.mxu2 %v1436_v17 }
  0x14   :  { %8 = vsyncpa [#allocation3], 0  ;;  %855 = vmatpush.bf16.msra.mxu1 %v1428_v18  ;;  %v1427_v23 = vld [vmem:[%s1883_s1 + $0x50] sm:$0xff]  ;;  %v1418_v25 = vld [vmem:[%s1883_s1 + $0x8] sm:$0xff]  ;;  %vm835_vm0 = vcmask 261120   ;;  %s1015_s23 = sshll.u32 %s1885_s3, 4  ;;  %s1016_s23 = int_to_ptr.hbm [resolvable:$true] %s1015_s23 }
  0x15   :  { %881 = vmatpush.bf16.msra.mxu3 %v1444_v19  ;;  %v1443_v24 = vld [vmem:[%s1883_s1 + $0xd0] sm:$0xff]  ;;  %v1434_v26 = vld [vmem:[%s1883_s1 + $0x88] sm:$0xff]  ;;  %v1417_v29 = vld [vmem:[%s1883_s1] sm:$0xff] }
  0x16   :  { %843 = vmatpush.bf16.msra.mxu0 %v1419_v21  ;;  %v1426_v27 = vld [vmem:[%s1883_s1 + $0x48] sm:$0xff]  ;;  %v1433_v30 = vld [vmem:[%s1883_s1 + $0x80] sm:$0xff]  ;;  %v1456_v31 = vld [vmem:[%s1883_s1 + $0x138] sm:$0xff] }
  0x17   :  { %869 = vmatpush.bf16.msra.mxu2 %v1435_v22  ;;  %v1442_v28 = vld [vmem:[%s1883_s1 + $0xc8] sm:$0xff]  ;;  %v1472_v32 = vld [vmem:[%s1883_s1 + $0x1b8] sm:$0xff]  ;;  %v1425_v33 = vld [vmem:[%s1883_s1 + $0x40] sm:$0xff] }
  0x18   :  { %856 = vmatpush.bf16.msra.mxu1 %v1427_v23  ;;  %v1441_v34 = vld [vmem:[%s1883_s1 + $0xc0] sm:$0xff]  ;;  %v1464_v35 = vld [vmem:[%s1883_s1 + $0x178] sm:$0xff]  ;;  %v1455_v37 = vld [vmem:[%s1883_s1 + $0x130] sm:$0xff] }
  0x19   :  { %882 = vmatpush.bf16.msra.mxu3 %v1443_v24  ;;  %v1480_v36 = vld [vmem:[%s1883_s1 + $0x1f8] sm:$0xff]  ;;  %v1471_v38 = vld [vmem:[%s1883_s1 + $0x1b0] sm:$0xff]  ;;  %v220_v40 = vld [vmem:[#allocation1] sm:$0xff] }
  0x1a   :  { %844 = vmatpush.bf16.msra.mxu0 %v1418_v25  ;;  %v222_v39 = vld [vmem:[#allocation1 + $0x12] sm:$0xff]  ;;  %v223_v43 = vld [vmem:[#allocation1 + $0x1b] sm:$0xff]  ;;  %v221_v44 = vld [vmem:[#allocation1 + $0x9] sm:$0xff] }
  0x1b   :  { %870 = vmatpush.bf16.msra.mxu2 %v1434_v26  ;;  %v1463_v41 = vld [vmem:[%s1883_s1 + $0x170] sm:$0xff]  ;;  %v1454_v45 = vld [vmem:[%s1883_s1 + $0x128] sm:$0xff]  ;;  %v1697_v49 = vld [vmem:[#allocation1 + $0x3f] sm:$0xff] }
  0x1c   :  { %857 = vmatpush.bf16.msra.mxu1 %v1426_v27  ;;  %v1479_v42 = vld [vmem:[%s1883_s1 + $0x1f0] sm:$0xff]  ;;  %v1470_v46 = vld [vmem:[%s1883_s1 + $0x1a8] sm:$0xff]  ;;  %v1453_v54 = vld [vmem:[%s1883_s1 + $0x120] sm:$0xff] }
  0x1d   :  { %883 = vmatpush.bf16.msra.mxu3 %v1442_v28  ;;  %v1693_v47 = vld [vmem:[#allocation1 + $0x36] sm:$0xff]  ;;  %v1695_v48 = vld [vmem:[#allocation1 + $0x24] sm:$0xff]  ;;  %v1702_v51 = vld [vmem:[#allocation1 + $0x2d] sm:$0xff] }
  0x1e   :  { %845 = vmatpush.bf16.msra.mxu0 %v1417_v29  ;;  %v17_v50 = vld [vmem:[%s1882_s0 + $0x8] sm:$0x1f]  ;;  %v1469_v55 = vld [vmem:[%s1883_s1 + $0x1a0] sm:$0xff]  ;;  %v1452_v58 = vld [vmem:[%s1883_s1 + $0x118] sm:$0xff] }
  0x1f   :  { %871 = vmatpush.bf16.msra.mxu2 %v1433_v30  ;;  %v1462_v52 = vld [vmem:[%s1883_s1 + $0x168] sm:$0xff]  ;;  %229 = vst [vmem:[#allocation1] ss:$9 sm:$0xff] %v17_v50  ;;  %v1461_v56 = vld [vmem:[%s1883_s1 + $0x160] sm:$0xff]  ;;  %v1468_v59 = vld [vmem:[%s1883_s1 + $0x198] sm:$0xff] }
  0x20   :  { %858 = vmatpush.bf16.msra.mxu1 %v1425_v33  ;;  %v1478_v53 = vld [vmem:[%s1883_s1 + $0x1e8] sm:$0xff]  ;;  %v1477_v57 = vld [vmem:[%s1883_s1 + $0x1e0] sm:$0xff]  ;;  %v1460_v60 = vld [vmem:[%s1883_s1 + $0x158] sm:$0xff] }
  0x21   :  { %884 = vmatpush.bf16.msra.mxu3 %v1441_v34  ;;  %846 = vmatmul.bf16.vlgmr.msra.gmra.mxu0 %v220_v40  ;;  %v1476_v61 = vld [vmem:[%s1883_s1 + $0x1d8] sm:$0xff]  ;;  %v1451_v62 = vld [vmem:[%s1883_s1 + $0x110] sm:$0xff]  ;;  %v1450_v2 = vld [vmem:[%s1883_s1 + $0x108] sm:$0xff] }
  0x22   :  { %890 = vmatpush.bf16.msrb.mxu0 %v1456_v31  ;;  %872 = vmatmul.bf16.vlgmr.msra.gmra.mxu2 %v222_v39  ;;  %v1467_v63 = vld [vmem:[%s1883_s1 + $0x190] sm:$0xff]  ;;  %v1466_v3 = vld [vmem:[%s1883_s1 + $0x188] sm:$0xff]  ;;  %v1449_v6 = vld [vmem:[%s1883_s1 + $0x100] sm:$0xff] }
  0x23   :  { %916 = vmatpush.bf16.msrb.mxu2 %v1472_v32  ;;  %859 = vmatmul.bf16.vlgmr.msra.gmra.mxu1 %v221_v44  ;;  %v1459_v0 = vld [vmem:[%s1883_s1 + $0x150] sm:$0xff]  ;;  %v1458_v4 = vld [vmem:[%s1883_s1 + $0x148] sm:$0xff]  ;;  %v1465_v7 = vld [vmem:[%s1883_s1 + $0x180] sm:$0xff] }
  0x24   :  { %903 = vmatpush.bf16.msrb.mxu1 %v1464_v35  ;;  %885 = vmatmul.bf16.vlgmr.msra.gmra.mxu3 %v223_v43  ;;  %v1475_v1 = vld [vmem:[%s1883_s1 + $0x1d0] sm:$0xff]  ;;  %v1474_v5 = vld [vmem:[%s1883_s1 + $0x1c8] sm:$0xff]  ;;  %v1488_v8 = vld [vmem:[%s1883_s1 + $0x238] sm:$0xff] }
  0x25   :  { %929 = vmatpush.bf16.msrb.mxu3 %v1480_v36  ;;  %v1504_v9 = vld [vmem:[%s1883_s1 + $0x2b8] sm:$0xff]  ;;  %v1457_v10 = vld [vmem:[%s1883_s1 + $0x140] sm:$0xff]  ;;  %v1487_v14 = vld [vmem:[%s1883_s1 + $0x230] sm:$0xff] }
  0x26   :  { %891 = vmatpush.bf16.msrb.mxu0 %v1455_v37  ;;  %v1473_v11 = vld [vmem:[%s1883_s1 + $0x1c0] sm:$0xff]  ;;  %v1496_v12 = vld [vmem:[%s1883_s1 + $0x278] sm:$0xff]  ;;  %v1503_v15 = vld [vmem:[%s1883_s1 + $0x2b0] sm:$0xff] }
  0x27   :  { %917 = vmatpush.bf16.msrb.mxu2 %v1471_v38  ;;  %v1512_v13 = vld [vmem:[%s1883_s1 + $0x2f8] sm:$0xff]  ;;  %v1495_v16 = vld [vmem:[%s1883_s1 + $0x270] sm:$0xff]  ;;  %v1486_v18 = vld [vmem:[%s1883_s1 + $0x228] sm:$0xff] }
  0x28   :  { %904 = vmatpush.bf16.msrb.mxu1 %v1463_v41  ;;  %v1511_v17 = vld [vmem:[%s1883_s1 + $0x2f0] sm:$0xff]  ;;  %v1502_v19 = vld [vmem:[%s1883_s1 + $0x2a8] sm:$0xff]  ;;  %v1485_v22 = vld [vmem:[%s1883_s1 + $0x220] sm:$0xff] }
  0x29   :  { %930 = vmatpush.bf16.msrb.mxu3 %v1479_v42  ;;  %v1494_v20 = vld [vmem:[%s1883_s1 + $0x268] sm:$0xff]  ;;  %v1501_v23 = vld [vmem:[%s1883_s1 + $0x2a0] sm:$0xff]  ;;  %v1484_v26 = vld [vmem:[%s1883_s1 + $0x218] sm:$0xff] }
  0x2a   :  { %892 = vmatpush.bf16.msrb.mxu0 %v1454_v45  ;;  %v1510_v21 = vld [vmem:[%s1883_s1 + $0x2e8] sm:$0xff]  ;;  %v1493_v24 = vld [vmem:[%s1883_s1 + $0x260] sm:$0xff]  ;;  %v1500_v27 = vld [vmem:[%s1883_s1 + $0x298] sm:$0xff] }
  0x2b   :  { %918 = vmatpush.bf16.msrb.mxu2 %v1470_v46  ;;  %v1509_v25 = vld [vmem:[%s1883_s1 + $0x2e0] sm:$0xff]  ;;  %v1492_v28 = vld [vmem:[%s1883_s1 + $0x258] sm:$0xff]  ;;  %v1483_v30 = vld [vmem:[%s1883_s1 + $0x210] sm:$0xff] }
  0x2c   :  { %905 = vmatpush.bf16.msrb.mxu1 %v1462_v52  ;;  %v1508_v29 = vld [vmem:[%s1883_s1 + $0x2d8] sm:$0xff]  ;;  %v1499_v31 = vld [vmem:[%s1883_s1 + $0x290] sm:$0xff]  ;;  %v1482_v34 = vld [vmem:[%s1883_s1 + $0x208] sm:$0xff] }
  0x2d   :  { %931 = vmatpush.bf16.msrb.mxu3 %v1478_v53  ;;  %v1491_v32 = vld [vmem:[%s1883_s1 + $0x250] sm:$0xff]  ;;  %v1498_v35 = vld [vmem:[%s1883_s1 + $0x288] sm:$0xff]  ;;  %v1481_v38 = vld [vmem:[%s1883_s1 + $0x200] sm:$0xff] }
  0x2e   :  { %893 = vmatpush.bf16.msrb.mxu0 %v1453_v54  ;;  %v1507_v33 = vld [vmem:[%s1883_s1 + $0x2d0] sm:$0xff]  ;;  %v1490_v36 = vld [vmem:[%s1883_s1 + $0x248] sm:$0xff]  ;;  %v1497_v39 = vld [vmem:[%s1883_s1 + $0x280] sm:$0xff] }
  0x2f   :  { %919 = vmatpush.bf16.msrb.mxu2 %v1469_v55  ;;  %v1506_v37 = vld [vmem:[%s1883_s1 + $0x2c8] sm:$0xff]  ;;  %v1489_v41 = vld [vmem:[%s1883_s1 + $0x240] sm:$0xff]  ;;  %v232_v44 = vld [vmem:[#allocation1 + $0x12] sm:$0xff] }
  0x30   :  { %906 = vmatpush.bf16.msrb.mxu1 %v1461_v56  ;;  %v1514_v40 = vld [vmem:[%s1883_s1 + $0x308] sm:$0xff]  ;;  %v1505_v42 = vld [vmem:[%s1883_s1 + $0x2c0] sm:$0xff] }
  0x31   :  { %932 = vmatpush.bf16.msrb.mxu3 %v1477_v57  ;;  %v230_v43 = vld [vmem:[#allocation1] sm:$0xff]  ;;  %v231_v45 = vld [vmem:[#allocation1 + $0x9] sm:$0xff] }
  0x32   :  { %894 = vmatpush.bf16.msrb.mxu0 %v1452_v58  ;;  %v233_v46 = vld [vmem:[#allocation1 + $0x1b] sm:$0xff] }
  0x33   :  { %920 = vmatpush.bf16.msrb.mxu2 %v1468_v59  ;;  %v1516_v57 = vld [vmem:[%s1884_s2] ss:$0 sm:$0xff] }
  0x34   :  { %907 = vmatpush.bf16.msrb.mxu1 %v1460_v60 }
  0x35   :  { %933 = vmatpush.bf16.msrb.mxu3 %v1476_v61 }
  0x36   :  { %895 = vmatpush.bf16.msrb.mxu0 %v1451_v62 }
  0x37   :  { %921 = vmatpush.bf16.msrb.mxu2 %v1467_v63 }
  0x38   :  { %908 = vmatpush.bf16.msrb.mxu1 %v1459_v0 }
  0x39   :  { %934 = vmatpush.bf16.msrb.mxu3 %v1475_v1 }
  0x3a   :  { %896 = vmatpush.bf16.msrb.mxu0 %v1450_v2 }
  0x3b   :  { %922 = vmatpush.bf16.msrb.mxu2 %v1466_v3 }
  0x3c   :  { %909 = vmatpush.bf16.msrb.mxu1 %v1458_v4 }
  0x3d   :  { %935 = vmatpush.bf16.msrb.mxu3 %v1474_v5 }
  0x3e   :  { %897 = vmatpush.bf16.msrb.mxu0 %v1449_v6 }
  0x3f   :  { %923 = vmatpush.bf16.msrb.mxu2 %v1465_v7 }
  0x40   :  { %910 = vmatpush.bf16.msrb.mxu1 %v1457_v10 }
  0x41   :  { %936 = vmatpush.bf16.msrb.mxu3 %v1473_v11  ;;  %898 = vmatmul.bf16.vlgmr.msrb.gmra.mxu0 %v1695_v48  ;;  %v234_v48 = vld [vmem:[#allocation1 + $0x24] sm:$0xff] }
  0x42   :  { %942 = vmatpush.bf16.msra.mxu0 %v1488_v8  ;;  %924 = vmatmul.bf16.vlgmr.msrb.gmra.mxu2 %v1693_v47  ;;  %v1513_v47 = vld [vmem:[%s1883_s1 + $0x300] sm:$0xff]  ;;  %s1543_s1 = smov [#allocation2]  }
  0x43   :  { %968 = vmatpush.bf16.msra.mxu2 %v1504_v9  ;;  %911 = vmatmul.bf16.vlgmr.msrb.gmra.mxu1 %v1702_v51  ;;  %s1013_s2 = sshll.u32 %s1543_s1, 4  ;;  %s1014_s2 = int_to_ptr.vmem [resolvable:$true] %s1013_s2 }
  0x44   :  { %955 = vmatpush.bf16.msra.mxu1 %v1496_v12  ;;  %937 = vmatmul.bf16.vlgmr.msrb.gmra.mxu3 %v1697_v49 }
  0x45   :  { %981 = vmatpush.bf16.msra.mxu3 %v1512_v13 }
  0x46   :  { %943 = vmatpush.bf16.msra.mxu0 %v1487_v14 }
  0x47   :  { %969 = vmatpush.bf16.msra.mxu2 %v1503_v15 }
  0x48   :  { %956 = vmatpush.bf16.msra.mxu1 %v1495_v16 }
  0x49   :  { %982 = vmatpush.bf16.msra.mxu3 %v1511_v17 }
  0x4a   :  { %944 = vmatpush.bf16.msra.mxu0 %v1486_v18 }
  0x4b   :  { %970 = vmatpush.bf16.msra.mxu2 %v1502_v19 }
  0x4c   :  { %957 = vmatpush.bf16.msra.mxu1 %v1494_v20 }
  0x4d   :  { %983 = vmatpush.bf16.msra.mxu3 %v1510_v21 }
  0x4e   :  { %945 = vmatpush.bf16.msra.mxu0 %v1485_v22 }
  0x4f   :  { %971 = vmatpush.bf16.msra.mxu2 %v1501_v23 }
  0x50   :  { %958 = vmatpush.bf16.msra.mxu1 %v1493_v24 }
  0x51   :  { %984 = vmatpush.bf16.msra.mxu3 %v1509_v25 }
  0x52   :  { %946 = vmatpush.bf16.msra.mxu0 %v1484_v26 }
  0x53   :  { %972 = vmatpush.bf16.msra.mxu2 %v1500_v27 }
  0x54   :  { %959 = vmatpush.bf16.msra.mxu1 %v1492_v28 }
  0x55   :  { %985 = vmatpush.bf16.msra.mxu3 %v1508_v29 }
  0x56   :  { %947 = vmatpush.bf16.msra.mxu0 %v1483_v30 }
  0x57   :  { %973 = vmatpush.bf16.msra.mxu2 %v1499_v31 }
  0x58   :  { %960 = vmatpush.bf16.msra.mxu1 %v1491_v32 }
  0x59   :  { %986 = vmatpush.bf16.msra.mxu3 %v1507_v33 }
  0x5a   :  { %948 = vmatpush.bf16.msra.mxu0 %v1482_v34 }
  0x5b   :  { %974 = vmatpush.bf16.msra.mxu2 %v1498_v35 }
  0x5c   :  { %961 = vmatpush.bf16.msra.mxu1 %v1490_v36 }
  0x5d   :  { %987 = vmatpush.bf16.msra.mxu3 %v1506_v37 }
  0x5e   :  { %949 = vmatpush.bf16.msra.mxu0 %v1481_v38 }
  0x5f   :  { %975 = vmatpush.bf16.msra.mxu2 %v1497_v39 }
  0x60   :  { %962 = vmatpush.bf16.msra.mxu1 %v1489_v41 }
  0x61   :  { %988 = vmatpush.bf16.msra.mxu3 %v1505_v42  ;;  %950 = vmatmul.bf16.vlgmr.msra.gmra.mxu0 %v230_v43 }
  0x62   :  { %1000 = vmatpush.bf16.msrb.mxu0 %v1514_v40  ;;  %976 = vmatmul.bf16.vlgmr.msra.gmra.mxu2 %v232_v44 }
  0x63   :  { %963 = vmatmul.bf16.vlgmr.msra.gmra.mxu1 %v231_v45 }
  0x64   :  { %989 = vmatmul.bf16.vlgmr.msra.gmra.mxu3 %v233_v46 }
  0x66   :  { %1001 = vmatpush.bf16.msrb.mxu0 %v1513_v47 }
  0x71   :  { %1416 = vmatmul.msk.bf16.vlgmr.msrb.gmra.mxu0 %vm835_vm0, %v234_v48 }
  0x9e   :  { %v847_v49 = vpop.f32.mrf.mxu0 }
  0x9f   :  { %v848_v60 = vadd.f32 %v1516_v57, %v847_v49 }
  0xa0   :  { %v860_v50 = vpop.f32.mrf.mxu1 }
  0xa1   :  { %v861_v62 = vadd.f32 %v860_v50, %v848_v60 }
  0xa5   :  { %v873_v51 = vpop.f32.mrf.mxu2 }
  0xa6   :  { %v849_v53 = vpop.f32.mrf.mxu0  ;;  %v874_v2 = vadd.f32 %v873_v51, %v861_v62 }
  0xa7   :  { %v886_v52 = vpop.f32.mrf.mxu3 }
  0xa8   :  { %v862_v54 = vpop.f32.mrf.mxu1  ;;  %v887_v4 = vadd.f32 %v886_v52, %v874_v2 }
  0xad   :  { %v875_v55 = vpop.f32.mrf.mxu2 }
  0xaf   :  { %v888_v56 = vpop.f32.mrf.mxu3 }
  0xbe   :  { %v899_v58 = vpop.f32.mrf.mxu0 }
  0xbf   :  { %v900_v6 = vadd.f32 %v899_v58, %v887_v4 }
  0xc0   :  { %v912_v59 = vpop.f32.mrf.mxu1 }
  0xc1   :  { %v913_v7 = vadd.f32 %v912_v59, %v900_v6 }
  0xc5   :  { %v925_v61 = vpop.f32.mrf.mxu2 }
  0xc6   :  { %v901_v0 = vpop.f32.mrf.mxu0  ;;  %v926_v8 = vadd.f32 %v925_v61, %v913_v7 }
  0xc7   :  { %v938_v63 = vpop.f32.mrf.mxu3 }
  0xc8   :  { %v914_v1 = vpop.f32.mrf.mxu1  ;;  %v939_v11 = vadd.f32 %v938_v63, %v926_v8 }
  0xcd   :  { %v927_v3 = vpop.f32.mrf.mxu2 }
  0xcf   :  { %v940_v5 = vpop.f32.mrf.mxu3 }
  0xde   :  { %v951_v9 = vpop.f32.mrf.mxu0 }
  0xdf   :  { %v952_v12 = vadd.f32 %v951_v9, %v939_v11 }
  0xe0   :  { %v964_v10 = vpop.f32.mrf.mxu1 }
  0xe1   :  { %v965_v16 = vadd.f32 %v964_v10, %v952_v12 }
  0xe5   :  { %v977_v13 = vpop.f32.mrf.mxu2 }
  0xe6   :  { %v953_v14 = vpop.f32.mrf.mxu0  ;;  %v978_v18 = vadd.f32 %v977_v13, %v965_v16 }
  0xe7   :  { %v990_v15 = vpop.f32.mrf.mxu3 }
  0xe8   :  { %v966_v17 = vpop.f32.mrf.mxu1  ;;  %v991_v20 = vadd.f32 %v990_v15, %v978_v18 }
  0xed   :  { %v979_v19 = vpop.f32.mrf.mxu2 }
  0xee   :  { %v1003_v22 = vpop.f32.mrf.mxu0 }
  0xef   :  { %v992_v21 = vpop.f32.mrf.mxu3  ;;  %v1004_v23 = vadd.f32 %v1003_v22, %v991_v20 }
  0xf1   :  { %1007 = vst [vmem:[#allocation2] sm:$0x3] %v1004_v23 }
  0xf2   :  { %1018 = dma.vmem_to_hbm [thread:$0]  %s1014_s2, 32, %s1016_s23, [#allocation3]  }
  0xf6   :  { %v1005_v24 = vpop.f32.mrf.mxu0 }
  0xf7   :  { %1541 = dma.done.wait [#allocation3], 32  }
  0xf8   :  { %1542 = vsyncadd [#allocation3], 4294967264 }
  0xf9   :  { %1023 = vsyncpa [#allocation3], 1 }

</bundles_post_ra>
